<compile_context>
chip_gen: v6e
topology: v6e:2x2x1
jax: 0.10.0
libtpu: 0.0.40
codegen_flags: <defaults>
</compile_context>

<pallas_src>
import jax
import jax.numpy as jnp
from jax import lax
from jax.experimental import pallas as pl
from jax.experimental.pallas import tpu as pltpu

H_IN = W_IN = 28          # MNIST spatial size (required so flatten -> 360)
KH = KW = 5               # conv kernel
H_CONV = W_CONV = 24      # 28 - 5 + 1
POOL = 4                  # MaxPool2d(4)
H_POOL = W_POOL = 6       # 24 / 4
C_OUT = 10                # conv out channels
FLAT = C_OUT * H_POOL * W_POOL   # 360
HID = 128
N_CLASSES = 10
TB = 128                  # batch tile = lane width


# ----------------------------------------------------------------------------
# One fused kernel: conv + maxpool + relu + folded (360 -> 10) linear.
# grid = (num_batch_tiles, C_OUT); one conv output channel per inner grid step.
# ----------------------------------------------------------------------------
def fused_kernel(x_ref, wconv_ref, w12_ref, out_ref, acc_ref, act_ref):
    # x_ref    : VMEM (28, 28, TB)  one batch tile, batch on the lane axis
    # wconv_ref: SMEM (250,)        conv weights, index c*25 + di*5 + dj
    # w12_ref  : VMEM (10, 36)      folded linear weight for channel c,
    #                               column index f' = b*6 + a
    # out_ref  : VMEM (10, TB)      logits, accumulated over the channel axis
    # acc_ref  : VMEM (24, 24, TB)  conv accumulator scratch
    # act_ref  : VMEM (36, TB)      pooled+relu activations for channel c
    c = pl.program_id(1)

    # ---- Conv2d (valid, stride 1, no bias) for output channel c -------------
    acc_ref[...] = jnp.zeros_like(acc_ref)

    def row_taps(di, carry):
        acc = acc_ref[...]
        base = c * (KH * KW) + di * KW
        for dj in range(KW):                       # static sublane offsets
            w = wconv_ref[base + dj]               # scalar from SMEM
            acc = acc + x_ref[pl.ds(di, H_CONV), dj:dj + W_CONV, :] * w
        acc_ref[...] = acc
        return carry

    lax.fori_loop(0, KH, row_taps, 0)

    # ---- MaxPool2d(4) + ReLU -> act (36, TB) with row index f' = b*6 + a ----
    acc = acc_ref[...]                                              # (24,24,TB)
    rmax = jnp.max(acc.reshape(H_POOL, POOL, W_CONV, acc.shape[-1]),
                   axis=1)                                          # (6,24,TB)
    for b in range(W_POOL):
        col = jnp.max(rmax[:, POOL * b:POOL * b + POOL, :], axis=1)  # (6, TB)
        act_ref[b * H_POOL:(b + 1) * H_POOL, :] = jnp.maximum(col, 0.0)

    # ---- folded Linear(360->128)->Linear(128->10): per-channel contribution -
    @pl.when(c == 0)
    def _():
        out_ref[...] = jnp.zeros_like(out_ref)

    out_ref[...] += jnp.dot(w12_ref[...], act_ref[...],
                            preferred_element_type=jnp.float32)


@jax.jit
def mnist_small_forward(x, conv_w, lin1_w, lin2_w):
    B = x.shape[0]

    # Fold the two bias-free linears: logits = flat @ W1.T @ W2.T = flat @ W12
    w12 = jnp.dot(lin1_w.T, lin2_w.T,
                  precision=jax.lax.Precision.HIGHEST)          # (360, 10)
    # Permute rows from PyTorch flatten order f = c*36 + a*6 + b into the
    # kernel's per-channel order f' = b*6 + a, and pre-transpose per channel.
    w12 = w12.reshape(C_OUT, H_POOL, W_POOL, N_CLASSES)          # (c, a, b, k)
    w12 = jnp.transpose(w12, (0, 3, 2, 1)).reshape(
        C_OUT, N_CLASSES, H_POOL * W_POOL)                       # (c, k, f')

    wconv = conv_w.reshape(C_OUT * KH * KW).astype(jnp.float32)  # (250,)

    # batch on the lane axis, padded to the batch tile
    nb = pl.cdiv(B, TB)
    b_pad = nb * TB
    x_l = jnp.transpose(x[:, 0, :, :], (1, 2, 0))                # (28, 28, B)
    if b_pad != B:
        x_l = jnp.pad(x_l, ((0, 0), (0, 0), (0, b_pad - B)))

    out = pl.pallas_call(
        fused_kernel,
        out_shape=jax.ShapeDtypeStruct((N_CLASSES, b_pad), jnp.float32),
        grid=(nb, C_OUT),
        in_specs=[
            pl.BlockSpec((H_IN, W_IN, TB), lambda i, c: (0, 0, i)),
            pl.BlockSpec(memory_space=pltpu.MemorySpace.SMEM),
            pl.BlockSpec((None, N_CLASSES, H_POOL * W_POOL),
                         lambda i, c: (c, 0, 0)),
        ],
        out_specs=pl.BlockSpec((N_CLASSES, TB), lambda i, c: (0, i)),
        scratch_shapes=[
            pltpu.VMEM((H_CONV, W_CONV, TB), jnp.float32),
            pltpu.VMEM((H_POOL * W_POOL, TB), jnp.float32),
        ],
        compiler_params=pltpu.CompilerParams(
            dimension_semantics=("parallel", "arbitrary")),
    )(x_l, wconv, w12)

    return out[:, :B].T                                          # (B, 10)


# ----------------------------------------------------------------------------
# Pure-JAX reference (mirrors the PyTorch forward) for verification.
# ----------------------------------------------------------------------------
def reference_forward(x, conv_w, lin1_w, lin2_w):
    conv = jax.lax.conv_general_dilated(
        x, conv_w, window_strides=(1, 1), padding="VALID",
        dimension_numbers=("NCHW", "OIHW", "NCHW"))
    B = x.shape[0]
    pooled = jnp.max(conv.reshape(B, C_OUT, H_POOL, POOL, W_POOL, POOL),
                     axis=(3, 5))
    act = jnp.maximum(pooled, 0.0)
    flat = act.reshape(B, FLAT)
    return flat @ lin1_w.T @ lin2_w.T


if __name__ == "__main__":
    key = jax.random.PRNGKey(0)
    kx, kc, k1, k2 = jax.random.split(key, 4)
    B = 2
    x = jax.random.normal(kx, (B, 1, H_IN, W_IN), jnp.float32)
    conv_w = jax.random.normal(kc, (C_OUT, 1, KH, KW), jnp.float32) * 0.1
    lin1_w = jax.random.normal(k1, (HID, FLAT), jnp.float32) * 0.05
    lin2_w = jax.random.normal(k2, (N_CLASSES, HID), jnp.float32) * 0.05

    out = mnist_small_forward(x, conv_w, lin1_w, lin2_w)
    out = jax.block_until_ready(out)

    ref = reference_forward(x, conv_w, lin1_w, lin2_w)
    assert out.shape == (B, N_CLASSES), out.shape
    max_err = float(jnp.max(jnp.abs(out - ref)))
    assert jnp.allclose(out, ref, atol=2e-2, rtol=2e-2), max_err
    print("KERNEL_OK")
</pallas_src>

<mosaic_0001>
module attributes {stable_mosaic.version = 11 : i64} {
  func.func @fused_kernel(%arg0: i32, %arg1: i32, %arg2: memref<28x28x128xf32, #tpu.memory_space<vmem>>, %arg3: memref<250xf32, #tpu.memory_space<smem>>, %arg4: memref<1x10x36xf32, #tpu.memory_space<vmem>>, %arg5: memref<10x128xf32, #tpu.memory_space<vmem>>, %arg6: memref<24x24x128xf32, #tpu.memory_space<vmem>>, %arg7: memref<36x128xf32, #tpu.memory_space<vmem>>) attributes {dimension_semantics = [#tpu.dimension_semantics<parallel>, #tpu.dimension_semantics<arbitrary>], iteration_bounds = array<i64: 1, 10>, scalar_prefetch = 0 : i64, scratch_operands = 2 : i64, tpu.core_type = #tpu.core_type<tc>, window_params = [{transform_indices = @transform_0, window_bounds = array<i64: 28, 28, 128>}, {transform_indices = @transform_1, window_bounds = array<i64: 250>}, {transform_indices = @transform_2, window_bounds = array<i64: 1, 10, 36>}, {transform_indices = @transform_3, window_bounds = array<i64: 10, 128>}]} {
    %cst = arith.constant 0.000000e+00 : f32
    %0 = vector.broadcast %cst : f32 to vector<24x24x128xf32>
    %c0 = arith.constant 0 : index
    %c0_0 = arith.constant 0 : index
    %c0_1 = arith.constant 0 : index
    %1 = vector.load %arg6[%c0, %c0_0, %c0_1] : memref<24x24x128xf32, #tpu.memory_space<vmem>>, vector<24x24x128xf32>
    tpu.vector_store %arg6[%c0, %c0_0, %c0_1], %0 {strides = array<i32>} : memref<24x24x128xf32, #tpu.memory_space<vmem>>, vector<24x24x128xf32>,
    %c0_i32 = arith.constant 0 : i32
    %c5_i32 = arith.constant 5 : i32
    %2 = arith.addi %c0_i32, %c5_i32 : i32
    %c1_i32 = arith.constant 1 : i32
    scf.for %arg8 = %c0_i32 to %2 step %c1_i32  : i32 {
      %c0_38 = arith.constant 0 : index
      %c0_39 = arith.constant 0 : index
      %c0_40 = arith.constant 0 : index
      %46 = vector.load %arg6[%c0_38, %c0_39, %c0_40] : memref<24x24x128xf32, #tpu.memory_space<vmem>>, vector<24x24x128xf32>
      %c25_i32 = arith.constant 25 : i32
      %47 = arith.muli %arg1, %c25_i32 : i32
      %c5_i32_41 = arith.constant 5 : i32
      %48 = arith.muli %arg8, %c5_i32_41 : i32
      %49 = arith.addi %47, %48 : i32
      %c0_i32_42 = arith.constant 0 : i32
      %50 = arith.addi %49, %c0_i32_42 : i32
      %51 = arith.index_cast %50 : i32 to index
      %52 = memref.load %arg3[%51] : memref<250xf32, #tpu.memory_space<smem>>
      %53 = arith.index_cast %arg8 : i32 to index
      %c0_43 = arith.constant 0 : index
      %c0_44 = arith.constant 0 : index
      %54 = vector.load %arg2[%53, %c0_43, %c0_44] : memref<28x28x128xf32, #tpu.memory_space<vmem>>, vector<24x24x128xf32>
      %55 = vector.broadcast %52 : f32 to vector<24x24x128xf32>
      %56 = arith.mulf %54, %55 : vector<24x24x128xf32>
      %57 = arith.addf %46, %56 : vector<24x24x128xf32>
      %c1_i32_45 = arith.constant 1 : i32
      %58 = arith.addi %49, %c1_i32_45 : i32
      %59 = arith.index_cast %58 : i32 to index
      %60 = memref.load %arg3[%59] : memref<250xf32, #tpu.memory_space<smem>>
      %61 = arith.index_cast %arg8 : i32 to index
      %c1 = arith.constant 1 : index
      %c0_46 = arith.constant 0 : index
      %62 = vector.load %arg2[%61, %c1, %c0_46] : memref<28x28x128xf32, #tpu.memory_space<vmem>>, vector<24x24x128xf32>
      %63 = vector.broadcast %60 : f32 to vector<24x24x128xf32>
      %64 = arith.mulf %62, %63 : vector<24x24x128xf32>
      %65 = arith.addf %57, %64 : vector<24x24x128xf32>
      %c2_i32 = arith.constant 2 : i32
      %66 = arith.addi %49, %c2_i32 : i32
      %67 = arith.index_cast %66 : i32 to index
      %68 = memref.load %arg3[%67] : memref<250xf32, #tpu.memory_space<smem>>
      %69 = arith.index_cast %arg8 : i32 to index
      %c2 = arith.constant 2 : index
      %c0_47 = arith.constant 0 : index
      %70 = vector.load %arg2[%69, %c2, %c0_47] : memref<28x28x128xf32, #tpu.memory_space<vmem>>, vector<24x24x128xf32>
      %71 = vector.broadcast %68 : f32 to vector<24x24x128xf32>
      %72 = arith.mulf %70, %71 : vector<24x24x128xf32>
      %73 = arith.addf %65, %72 : vector<24x24x128xf32>
      %c3_i32 = arith.constant 3 : i32
      %74 = arith.addi %49, %c3_i32 : i32
      %75 = arith.index_cast %74 : i32 to index
      %76 = memref.load %arg3[%75] : memref<250xf32, #tpu.memory_space<smem>>
      %77 = arith.index_cast %arg8 : i32 to index
      %c3 = arith.constant 3 : index
      %c0_48 = arith.constant 0 : index
      %78 = vector.load %arg2[%77, %c3, %c0_48] : memref<28x28x128xf32, #tpu.memory_space<vmem>>, vector<24x24x128xf32>
      %79 = vector.broadcast %76 : f32 to vector<24x24x128xf32>
      %80 = arith.mulf %78, %79 : vector<24x24x128xf32>
      %81 = arith.addf %73, %80 : vector<24x24x128xf32>
      %c4_i32 = arith.constant 4 : i32
      %82 = arith.addi %49, %c4_i32 : i32
      %83 = arith.index_cast %82 : i32 to index
      %84 = memref.load %arg3[%83] : memref<250xf32, #tpu.memory_space<smem>>
      %85 = arith.index_cast %arg8 : i32 to index
      %c4 = arith.constant 4 : index
      %c0_49 = arith.constant 0 : index
      %86 = vector.load %arg2[%85, %c4, %c0_49] : memref<28x28x128xf32, #tpu.memory_space<vmem>>, vector<24x24x128xf32>
      %87 = vector.broadcast %84 : f32 to vector<24x24x128xf32>
      %88 = arith.mulf %86, %87 : vector<24x24x128xf32>
      %89 = arith.addf %81, %88 : vector<24x24x128xf32>
      %c0_50 = arith.constant 0 : index
      %c0_51 = arith.constant 0 : index
      %c0_52 = arith.constant 0 : index
      %90 = vector.load %arg6[%c0_50, %c0_51, %c0_52] : memref<24x24x128xf32, #tpu.memory_space<vmem>>, vector<24x24x128xf32>
      tpu.vector_store %arg6[%c0_50, %c0_51, %c0_52], %89 {strides = array<i32>} : memref<24x24x128xf32, #tpu.memory_space<vmem>>, vector<24x24x128xf32>,
    }
    %c5_i32_2 = arith.constant 5 : i32
    %c0_3 = arith.constant 0 : index
    %c0_4 = arith.constant 0 : index
    %c0_5 = arith.constant 0 : index
    %3 = vector.load %arg6[%c0_3, %c0_4, %c0_5] : memref<24x24x128xf32, #tpu.memory_space<vmem>>, vector<24x24x128xf32>
    %4 = vector.shape_cast %3 : vector<24x24x128xf32> to vector<6x4x24x128xf32>
    %cst_6 = arith.constant dense<0xFF800000> : vector<6x24x128xf32>
    %5 = vector.multi_reduction <maximumf>, %4, %cst_6 [1] : vector<6x4x24x128xf32> to vector<6x24x128xf32>
    %6 = vector.extract_strided_slice %5 {offsets = [0, 0, 0], sizes = [6, 4, 128], strides = [1, 1, 1]} : vector<6x24x128xf32> to vector<6x4x128xf32>
    %cst_7 = arith.constant dense<0xFF800000> : vector<6x128xf32>
    %7 = vector.multi_reduction <maximumf>, %6, %cst_7 [1] : vector<6x4x128xf32> to vector<6x128xf32>
    %cst_8 = arith.constant 0.000000e+00 : f32
    %8 = vector.broadcast %cst_8 : f32 to vector<6x128xf32>
    %9 = arith.maximumf %7, %8 : vector<6x128xf32>
    %c0_9 = arith.constant 0 : index
    %c0_10 = arith.constant 0 : index
    %10 = vector.load %arg7[%c0_9, %c0_10] : memref<36x128xf32, #tpu.memory_space<vmem>>, vector<6x128xf32>
    tpu.vector_store %arg7[%c0_9, %c0_10], %9 {strides = array<i32>} : memref<36x128xf32, #tpu.memory_space<vmem>>, vector<6x128xf32>,
    %11 = vector.extract_strided_slice %5 {offsets = [0, 4, 0], sizes = [6, 4, 128], strides = [1, 1, 1]} : vector<6x24x128xf32> to vector<6x4x128xf32>
    %cst_11 = arith.constant dense<0xFF800000> : vector<6x128xf32>
    %12 = vector.multi_reduction <maximumf>, %11, %cst_11 [1] : vector<6x4x128xf32> to vector<6x128xf32>
    %cst_12 = arith.constant 0.000000e+00 : f32
    %13 = vector.broadcast %cst_12 : f32 to vector<6x128xf32>
    %14 = arith.maximumf %12, %13 : vector<6x128xf32>
    %c6 = arith.constant 6 : index
    %c0_13 = arith.constant 0 : index
    %15 = vector.load %arg7[%c6, %c0_13] : memref<36x128xf32, #tpu.memory_space<vmem>>, vector<6x128xf32>
    tpu.vector_store %arg7[%c6, %c0_13], %14 {strides = array<i32>} : memref<36x128xf32, #tpu.memory_space<vmem>>, vector<6x128xf32>,
    %16 = vector.extract_strided_slice %5 {offsets = [0, 8, 0], sizes = [6, 4, 128], strides = [1, 1, 1]} : vector<6x24x128xf32> to vector<6x4x128xf32>
    %cst_14 = arith.constant dense<0xFF800000> : vector<6x128xf32>
    %17 = vector.multi_reduction <maximumf>, %16, %cst_14 [1] : vector<6x4x128xf32> to vector<6x128xf32>
    %cst_15 = arith.constant 0.000000e+00 : f32
    %18 = vector.broadcast %cst_15 : f32 to vector<6x128xf32>
    %19 = arith.maximumf %17, %18 : vector<6x128xf32>
    %c12 = arith.constant 12 : index
    %c0_16 = arith.constant 0 : index
    %20 = vector.load %arg7[%c12, %c0_16] : memref<36x128xf32, #tpu.memory_space<vmem>>, vector<6x128xf32>
    tpu.vector_store %arg7[%c12, %c0_16], %19 {strides = array<i32>} : memref<36x128xf32, #tpu.memory_space<vmem>>, vector<6x128xf32>,
    %21 = vector.extract_strided_slice %5 {offsets = [0, 12, 0], sizes = [6, 4, 128], strides = [1, 1, 1]} : vector<6x24x128xf32> to vector<6x4x128xf32>
    %cst_17 = arith.constant dense<0xFF800000> : vector<6x128xf32>
    %22 = vector.multi_reduction <maximumf>, %21, %cst_17 [1] : vector<6x4x128xf32> to vector<6x128xf32>
    %cst_18 = arith.constant 0.000000e+00 : f32
    %23 = vector.broadcast %cst_18 : f32 to vector<6x128xf32>
    %24 = arith.maximumf %22, %23 : vector<6x128xf32>
    %c18 = arith.constant 18 : index
    %c0_19 = arith.constant 0 : index
    %25 = vector.load %arg7[%c18, %c0_19] : memref<36x128xf32, #tpu.memory_space<vmem>>, vector<6x128xf32>
    tpu.vector_store %arg7[%c18, %c0_19], %24 {strides = array<i32>} : memref<36x128xf32, #tpu.memory_space<vmem>>, vector<6x128xf32>,
    %26 = vector.extract_strided_slice %5 {offsets = [0, 16, 0], sizes = [6, 4, 128], strides = [1, 1, 1]} : vector<6x24x128xf32> to vector<6x4x128xf32>
    %cst_20 = arith.constant dense<0xFF800000> : vector<6x128xf32>
    %27 = vector.multi_reduction <maximumf>, %26, %cst_20 [1] : vector<6x4x128xf32> to vector<6x128xf32>
    %cst_21 = arith.constant 0.000000e+00 : f32
    %28 = vector.broadcast %cst_21 : f32 to vector<6x128xf32>
    %29 = arith.maximumf %27, %28 : vector<6x128xf32>
    %c24 = arith.constant 24 : index
    %c0_22 = arith.constant 0 : index
    %30 = vector.load %arg7[%c24, %c0_22] : memref<36x128xf32, #tpu.memory_space<vmem>>, vector<6x128xf32>
    tpu.vector_store %arg7[%c24, %c0_22], %29 {strides = array<i32>} : memref<36x128xf32, #tpu.memory_space<vmem>>, vector<6x128xf32>,
    %31 = vector.extract_strided_slice %5 {offsets = [0, 20, 0], sizes = [6, 4, 128], strides = [1, 1, 1]} : vector<6x24x128xf32> to vector<6x4x128xf32>
    %cst_23 = arith.constant dense<0xFF800000> : vector<6x128xf32>
    %32 = vector.multi_reduction <maximumf>, %31, %cst_23 [1] : vector<6x4x128xf32> to vector<6x128xf32>
    %cst_24 = arith.constant 0.000000e+00 : f32
    %33 = vector.broadcast %cst_24 : f32 to vector<6x128xf32>
    %34 = arith.maximumf %32, %33 : vector<6x128xf32>
    %c30 = arith.constant 30 : index
    %c0_25 = arith.constant 0 : index
    %35 = vector.load %arg7[%c30, %c0_25] : memref<36x128xf32, #tpu.memory_space<vmem>>, vector<6x128xf32>
    tpu.vector_store %arg7[%c30, %c0_25], %34 {strides = array<i32>} : memref<36x128xf32, #tpu.memory_space<vmem>>, vector<6x128xf32>,
    %c0_i32_26 = arith.constant 0 : i32
    %36 = arith.cmpi eq, %arg1, %c0_i32_26 : i32
    %37 = arith.extui %36 : i1 to i32
    %c0_i32_27 = arith.constant 0 : i32
    %38 = arith.cmpi ne, %37, %c0_i32_27 : i32
    scf.if %38 {
      %cst_38 = arith.constant 0.000000e+00 : f32
      %46 = vector.broadcast %cst_38 : f32 to vector<10x128xf32>
      %c0_39 = arith.constant 0 : index
      %c0_40 = arith.constant 0 : index
      %47 = vector.load %arg5[%c0_39, %c0_40] : memref<10x128xf32, #tpu.memory_space<vmem>>, vector<10x128xf32>
      tpu.vector_store %arg5[%c0_39, %c0_40], %46 {strides = array<i32>} : memref<10x128xf32, #tpu.memory_space<vmem>>, vector<10x128xf32>,
    } else {
    }
    %c0_28 = arith.constant 0 : index
    %c0_29 = arith.constant 0 : index
    %39 = vector.load %arg5[%c0_28, %c0_29] : memref<10x128xf32, #tpu.memory_space<vmem>>, vector<10x128xf32>
    %c0_30 = arith.constant 0 : index
    %c0_31 = arith.constant 0 : index
    %c0_32 = arith.constant 0 : index
    %40 = vector.load %arg4[%c0_30, %c0_31, %c0_32] : memref<1x10x36xf32, #tpu.memory_space<vmem>>, vector<1x10x36xf32>
    %41 = vector.shape_cast %40 : vector<1x10x36xf32> to vector<10x36xf32>
    %c0_33 = arith.constant 0 : index
    %c0_34 = arith.constant 0 : index
    %42 = vector.load %arg7[%c0_33, %c0_34] : memref<36x128xf32, #tpu.memory_space<vmem>>, vector<36x128xf32>
    %cst_35 = arith.constant dense<0.000000e+00> : vector<10x128xf32>
    %43 = tpu.matmul %41, %42, %cst_35 {dimension_numbers = #tpu.dot_dimension_numbers<[1], [0], [0], [1], [0, 0, 1, 1], [], []>} : vector<10x36xf32>, vector<36x128xf32>, vector<10x128xf32> -> vector<10x128xf32>
    %44 = arith.addf %39, %43 : vector<10x128xf32>
    %c0_36 = arith.constant 0 : index
    %c0_37 = arith.constant 0 : index
    %45 = vector.load %arg5[%c0_36, %c0_37] : memref<10x128xf32, #tpu.memory_space<vmem>>, vector<10x128xf32>
    tpu.vector_store %arg5[%c0_36, %c0_37], %44 {strides = array<i32>} : memref<10x128xf32, #tpu.memory_space<vmem>>, vector<10x128xf32>,
    return
  }
  func.func @transform_0(%arg0: i32, %arg1: i32) -> (i32, i32, i32) {
    %c0_i32 = arith.constant 0 : i32
    %c0_i32_0 = arith.constant 0 : i32
    %c0_i32_1 = arith.constant 0 : i32
    return %c0_i32, %c0_i32_0, %arg0 : i32, i32, i32
  }
  func.func @transform_1(%arg0: i32, %arg1: i32) -> i32 {
    %c0_i32 = arith.constant 0 : i32
    %c0_i32_0 = arith.constant 0 : i32
    return %c0_i32 : i32
  }
  func.func @transform_2(%arg0: i32, %arg1: i32) -> (i32, i32, i32) {
    %c0_i32 = arith.constant 0 : i32
    %c0_i32_0 = arith.constant 0 : i32
    %c0_i32_1 = arith.constant 0 : i32
    return %arg1, %c0_i32, %c0_i32_0 : i32, i32, i32
  }
  func.func @transform_3(%arg0: i32, %arg1: i32) -> (i32, i32) {
    %c0_i32 = arith.constant 0 : i32
    %c0_i32_0 = arith.constant 0 : i32
    return %c0_i32, %arg0 : i32, i32
  }
}

</mosaic_0001>

<bundles_post_ra>
// kernel: mnist_small_forward.1
= control target key start
LH: loop header
LB: loop body
LE: loop exit
PB: predicated region body
PF: predicated region fallthrough
CT: control target
= control target key end

     0   :  { %8 = vsyncpa [#allocation5], 0  ;;  %s2386_s12 = smov 0   ;;  %s2388_s13 = smov 0   ;;  %s3426_s0 = inlined_call_operand.vmem [shape: f32[28,28,128], index: 0, kind: input, shape index: {}]   ;;  %s3427_s1 = inlined_call_operand.vmem [shape: f32[250], index: 1, kind: input, shape index: {}]   ;;  %s3428_s2 = inlined_call_operand.vmem [shape: f32[10,10,36], index: 2, kind: input, shape index: {}]   ;;  %s3429_s3 = inlined_call_operand.vmem [shape: f32[10,128], index: 3, kind: output, shape index: {}]  }
   0x1   :  { %s2390_s14 = smov 0  }
   0x2 LB: > { %s2229_s15 = sadd.s32 4294967295, %s2357_s14   ;;  %s23_s16 = sadd.s32 1, %s2353_s13  ;;  %s2357_s14 = sphi %s2390_s14, %s14_s14   ;;  %s2353_s13 = sphi %s2388_s13, %s3433_s13   ;;  %s2349_s12 = sphi %s2386_s12, %s3432_s12  }
   0x3   : > { %p24_p0 = scmp.ge.s32.totalorder %s23_s16, 10  ;;  %p2230_p1 = scmp.ge.s32.totalorder %s2357_s14, 1 }
   0x4   : > { %p130_p2 = scmp.lt.s32.totalorder %s2357_s14, 11  ;;  %p2411_p4 = scmp.eq.s32.totalorder %s2229_s15, 0 }
   0x5   : > { %s3435_s16 = smov (%p24_p0, %s23_s16), 0  ;;  %s150_s21 = sshll.u32 %s3427_s1, 4  ;;  %s151_s21 = int_to_ptr.vmem [resolvable:$true] %s150_s21 }
   0x6   : > { %p2407_p3 = pnand %p2230_p1, %p130_p2  ;;  %s2312_s22 = scalar_lea.vmem %s151_s21, 32 }
   0x7   : > { %p2313_p7 = scmp.ne.s32.totalorder %s151_s21, %s2312_s22  ;;  %p2320_p11 = scmp.lt.s32.totalorder %s151_s21, %s151_s21 }
   0x8   : > { %p2271_p5 = pneg %p2407_p3  ;;  %p2321_p12 = scmp.lt.s32.totalorder %s2312_s22, %s2312_s22 }
   0xa   : > { %p2272_p6 = pnand %p2411_p4, %p2271_p5  ;;  %p2322_p13 = por %p2321_p12, %p2320_p11 }
   0xc   : > { %p2314_p8 = pneg %p2272_p6 }
   0xe   : > { %p2315_p9 = pnand %p2314_p8, %p2313_p7 }
  0x10   : > { %p2316_p10 = pneg %p2315_p9 }
  0x12   : > { %p2323_p0 = pnand %p2322_p13, %p2316_p10 }
  0x14   : > { %2326 = shalt.err (!%p2323_p0)
}
  0x15   : > { %s2363_s23 = smov [#allocation4]   ;;  %171 = sbr.rel (%p2407_p3) target bundleno = 577 (0x241), region = 32 }
  0x16   : > { %2274 = dma.vmem_to_smem (!%p2272_p6), %s151_s21, 32, %s2363_s23, [#allocation5]  }
  0x1a   : > { %2344 = dma.done.wait (%p2411_p4), [#allocation5], 32  }
  0x1b   : > { %2346 = vsyncadd (%p2411_p4), [#allocation5], 4294967264 }
  0x1c   : > { %177 = sfence }
  0x1d   : > { %p203_p1 = scmp.lt.s32.totalorder %s2349_s12, 9  ;;  %v2364_v0 = vmov 0.0   ;;  %s2509_s29 = smov 0  }
  0x1e   : > { %212 = vst [vmem:[#allocation2 + $0xc8] sm:$0xff] %v2364_v0  ;;  %213 = vst [vmem:[#allocation2 + $0x8] sm:$0xff] %v2364_v0 }
  0x1f   : > { %214 = vst [vmem:[#allocation2 + $0x40] sm:$0xff] %v2364_v0  ;;  %215 = vst [vmem:[#allocation2 + $0x28] sm:$0xff] %v2364_v0  ;;  %s204_s24 = scalar_select %p203_p1, %s2349_s12, 9 }
  0x20   : > { %216 = vst [vmem:[#allocation2 + $0xe8] sm:$0xff] %v2364_v0  ;;  %217 = vst [vmem:[#allocation2 + $0xf0] sm:$0xff] %v2364_v0 }
  0x21   : > { %218 = vst [vmem:[#allocation2 + $0x70] sm:$0xff] %v2364_v0  ;;  %219 = vst [vmem:[#allocation2 + $0x120] sm:$0xff] %v2364_v0  ;;  %s2246_s25 = sshll.u32 %s204_s24, 4 }
  0x22   : > { %220 = vst [vmem:[#allocation2 + $0xd8] sm:$0xff] %v2364_v0  ;;  %221 = vst [vmem:[#allocation2 + $0x18] sm:$0xff] %v2364_v0  ;;  %s2507_s28 = scalar_lea.vmem %s3428_s2, %s2246_s25 }
  0x23   : > { %222 = vst [vmem:[#allocation2 + $0xb0] sm:$0xff] %v2364_v0  ;;  %223 = vst [vmem:[#allocation2 + $0x158] sm:$0xff] %v2364_v0 }
  0x24   : > { %224 = vst [vmem:[#allocation2 + $0x108] sm:$0xff] %v2364_v0  ;;  %225 = vst [vmem:[#allocation2 + $0x110] sm:$0xff] %v2364_v0 }
  0x25   : > { %226 = vst [vmem:[#allocation2 + $0x1f8] sm:$0xff] %v2364_v0  ;;  %227 = vst [vmem:[#allocation2 + $0xb8] sm:$0xff] %v2364_v0 }
  0x26   : > { %228 = vst [vmem:[#allocation2 + $0x180] sm:$0xff] %v2364_v0  ;;  %229 = vst [vmem:[#allocation2 + $0x190] sm:$0xff] %v2364_v0 }
  0x27   : > { %230 = vst [vmem:[#allocation2 + $0x140] sm:$0xff] %v2364_v0  ;;  %231 = vst [vmem:[#allocation2 + $0x1c0] sm:$0xff] %v2364_v0 }
  0x28   : > { %232 = vst [vmem:[#allocation2 + $0xd0] sm:$0xff] %v2364_v0  ;;  %233 = vst [vmem:[#allocation2 + $0x138] sm:$0xff] %v2364_v0 }
  0x29   : > { %234 = vst [vmem:[#allocation2 + $0x60] sm:$0xff] %v2364_v0  ;;  %235 = vst [vmem:[#allocation2 + $0x1b8] sm:$0xff] %v2364_v0 }
  0x2a   : > { %236 = vst [vmem:[#allocation2 + $0x88] sm:$0xff] %v2364_v0  ;;  %237 = vst [vmem:[#allocation2] sm:$0xff] %v2364_v0 }
  0x2b   : > { %238 = vst [vmem:[#allocation2 + $0x188] sm:$0xff] %v2364_v0  ;;  %239 = vst [vmem:[#allocation2 + $0x38] sm:$0xff] %v2364_v0 }
  0x2c   : > { %240 = vst [vmem:[#allocation2 + $0x1a8] sm:$0xff] %v2364_v0  ;;  %241 = vst [vmem:[#allocation2 + $0x220] sm:$0xff] %v2364_v0 }
  0x2d   : > { %242 = vst [vmem:[#allocation2 + $0x1e8] sm:$0xff] %v2364_v0  ;;  %243 = vst [vmem:[#allocation2 + $0x1c8] sm:$0xff] %v2364_v0 }
  0x2e   : > { %244 = vst [vmem:[#allocation2 + $0x80] sm:$0xff] %v2364_v0  ;;  %245 = vst [vmem:[#allocation2 + $0xf8] sm:$0xff] %v2364_v0 }
  0x2f   : > { %246 = vst [vmem:[#allocation2 + $0x78] sm:$0xff] %v2364_v0  ;;  %247 = vst [vmem:[#allocation2 + $0x170] sm:$0xff] %v2364_v0 }
  0x30   : > { %248 = vst [vmem:[#allocation2 + $0x198] sm:$0xff] %v2364_v0  ;;  %249 = vst [vmem:[#allocation2 + $0xe0] sm:$0xff] %v2364_v0 }
  0x31   : > { %250 = vst [vmem:[#allocation2 + $0x1e0] sm:$0xff] %v2364_v0  ;;  %251 = vst [vmem:[#allocation2 + $0x1f0] sm:$0xff] %v2364_v0 }
  0x32   : > { %252 = vst [vmem:[#allocation2 + $0x48] sm:$0xff] %v2364_v0  ;;  %253 = vst [vmem:[#allocation2 + $0x98] sm:$0xff] %v2364_v0 }
  0x33   : > { %254 = vst [vmem:[#allocation2 + $0x238] sm:$0xff] %v2364_v0  ;;  %255 = vst [vmem:[#allocation2 + $0x160] sm:$0xff] %v2364_v0 }
  0x34   : > { %256 = vst [vmem:[#allocation2 + $0x50] sm:$0xff] %v2364_v0  ;;  %257 = vst [vmem:[#allocation2 + $0x100] sm:$0xff] %v2364_v0 }
  0x35   : > { %258 = vst [vmem:[#allocation2 + $0x30] sm:$0xff] %v2364_v0  ;;  %259 = vst [vmem:[#allocation2 + $0x1b0] sm:$0xff] %v2364_v0 }
  0x36   : > { %260 = vst [vmem:[#allocation2 + $0x90] sm:$0xff] %v2364_v0  ;;  %261 = vst [vmem:[#allocation2 + $0x130] sm:$0xff] %v2364_v0 }
  0x37   : > { %262 = vst [vmem:[#allocation2 + $0x68] sm:$0xff] %v2364_v0  ;;  %263 = vst [vmem:[#allocation2 + $0x230] sm:$0xff] %v2364_v0 }
  0x38   : > { %264 = vst [vmem:[#allocation2 + $0x1d8] sm:$0xff] %v2364_v0  ;;  %265 = vst [vmem:[#allocation2 + $0x228] sm:$0xff] %v2364_v0 }
  0x39   : > { %266 = vst [vmem:[#allocation2 + $0x218] sm:$0xff] %v2364_v0  ;;  %267 = vst [vmem:[#allocation2 + $0x200] sm:$0xff] %v2364_v0 }
  0x3a   : > { %268 = vst [vmem:[#allocation2 + $0x10] sm:$0xff] %v2364_v0  ;;  %269 = vst [vmem:[#allocation2 + $0x128] sm:$0xff] %v2364_v0 }
  0x3b   : > { %270 = vst [vmem:[#allocation2 + $0x178] sm:$0xff] %v2364_v0  ;;  %271 = vst [vmem:[#allocation2 + $0x208] sm:$0xff] %v2364_v0 }
  0x3c   : > { %272 = vst [vmem:[#allocation2 + $0x210] sm:$0xff] %v2364_v0  ;;  %273 = vst [vmem:[#allocation2 + $0x1d0] sm:$0xff] %v2364_v0 }
  0x3d   : > { %274 = vst [vmem:[#allocation2 + $0x168] sm:$0xff] %v2364_v0  ;;  %275 = vst [vmem:[#allocation2 + $0xc0] sm:$0xff] %v2364_v0 }
  0x3e   : > { %276 = vst [vmem:[#allocation2 + $0x1a0] sm:$0xff] %v2364_v0  ;;  %277 = vst [vmem:[#allocation2 + $0x58] sm:$0xff] %v2364_v0 }
  0x3f   : > { %278 = vst [vmem:[#allocation2 + $0x118] sm:$0xff] %v2364_v0  ;;  %279 = vst [vmem:[#allocation2 + $0x20] sm:$0xff] %v2364_v0 }
  0x40   : > { %280 = vst [vmem:[#allocation2 + $0x148] sm:$0xff] %v2364_v0  ;;  %281 = vst [vmem:[#allocation2 + $0xa8] sm:$0xff] %v2364_v0 }
  0x41   : > { %282 = vst [vmem:[#allocation2 + $0x150] sm:$0xff] %v2364_v0  ;;  %283 = vst [vmem:[#allocation2 + $0xa0] sm:$0xff] %v2364_v0 }
  0x42 LB: >> { %s362_s30 = smul.u32 25, %s2349_s12  ;;  %s2238_s5 = sshll.u32 %s2361_s29, 5  ;;  %v290_v6 = vld [vmem:[#allocation2 + $0xc8] sm:$0xff]  ;;  %v292_v20 = vld [vmem:[#allocation2 + $0x40] sm:$0xff]  ;;  %s2361_s29 = sphi %s2509_s29, %s289_s29  }
  0x43   : >> { %s363_s4 = smul.u32 5, %s2361_s29  ;;  %s2520_s9 = scalar_lea.vmem %s3426_s0, %s2238_s5  ;;  %v291_v9 = vld [vmem:[#allocation2 + $0x8] sm:$0xff] }
  0x44   : >> { %v368_v1 = vld [vmem:[%s2520_s9] sm:$0xff]  ;;  %v369_v2 = vld [vmem:[%s2520_s9 + $0x8] sm:$0xff]  ;;  %v370_v5 = vld [vmem:[%s2520_s9 + $0x10] sm:$0xff]  ;;  %s289_s29 = sadd.s32 1, %s2361_s29  }
  0x45   : >> { %s364_s6 = sadd.s32 %s363_s4, %s362_s30  ;;  %v587_v3 = vld [vmem:[%s2520_s9 + $0x1] sm:$0xff]  ;;  %v588_v4 = vld [vmem:[%s2520_s9 + $0x9] sm:$0xff]  ;;  %v589_v14 = vld [vmem:[%s2520_s9 + $0x11] sm:$0xff]  ;;  %p286_p2 = scmp.ge.s32.totalorder %s289_s29, 5  }
  0x46   : >> { %s365_s10 = sld [smem:[#allocation4 + %s364_s6]]  ;;  %s585_s11 = sadd.s32 1, %s364_s6  ;;  %v806_v8 = vld [vmem:[%s2520_s9 + $0x2] sm:$0xff]  ;;  %v807_v13 = vld [vmem:[%s2520_s9 + $0xa] sm:$0xff]  ;;  %v808_v28 = vld [vmem:[%s2520_s9 + $0x12] sm:$0xff]  ;;  %vm1659_vm0 = vcmask (%p286_p2), 1043456  }
  0x47   : >> { %s586_s15 = sld [smem:[#allocation4 + %s585_s11]]  ;;  %s804_s17 = sadd.s32 2, %s364_s6  ;;  %v1025_v17 = vld [vmem:[%s2520_s9 + $0x3] sm:$0xff]  ;;  %v1026_v19 = vld [vmem:[%s2520_s9 + $0xb] sm:$0xff]  ;;  %v1027_v38 = vld [vmem:[%s2520_s9 + $0x13] sm:$0xff]  ;;  %vm1726_vm1 = vcmask (%p286_p2), 1047556  }
  0x48   : >> { %s805_s18 = sld [smem:[#allocation4 + %s804_s17]]  ;;  %s1023_s19 = sadd.s32 3, %s364_s6  ;;  %v1244_v25 = vld [vmem:[%s2520_s9 + $0x4] sm:$0xff]  ;;  %v1245_v27 = vld [vmem:[%s2520_s9 + $0xc] sm:$0xff]  ;;  %v1246_v39 = vld [vmem:[%s2520_s9 + $0x14] sm:$0xff]  ;;  %vm1714_vm2 = vcmask (%p286_p2), 1041409  }
  0x49   : >> { %s1024_s20 = sld [smem:[#allocation4 + %s1023_s19]]  ;;  %s1242_s21 = sadd.s32 4, %s364_s6  ;;  %v371_v32 = vld [vmem:[%s2520_s9 + $0x20] sm:$0xff]  ;;  %v293_v45 = vld [vmem:[#allocation2 + $0x28] sm:$0xff]  ;;  %v373_v63 = vld [vmem:[%s2520_s9 + $0x30] sm:$0xff]  ;;  %vm1716_vm3 = vcmask (%p286_p2), 1042434  }
  0x4a   : >> { %s1243_s22 = sld [smem:[#allocation4 + %s1242_s21]]  ;;  %v590_v33 = vld [vmem:[%s2520_s9 + $0x21] sm:$0xff]  ;;  %v591_v52 = vld [vmem:[%s2520_s9 + $0x29] sm:$0xff]  ;;  %v592_v0 = vld [vmem:[%s2520_s9 + $0x31] sm:$0xff]  ;;  %vm1718_vm4 = vcmask (%p286_p2), 1043459   ;;  %vm1720_vm5 = vcmask (%p286_p2), 1044484  }
  0x4b   : >> { %v809_v40 = vld [vmem:[%s2520_s9 + $0x22] sm:$0xff]  ;;  %v810_v53 = vld [vmem:[%s2520_s9 + $0x2a] sm:$0xff]  ;;  %vm1722_vm6 = vcmask (%p286_p2), 1045509   ;;  %p2239_p3 = scmp.ne.s32.totalorder (%p286_p2), %s2349_s12, 0 }
  0x4c   : >> { %v2527_v7 = vstv %s365_s10  ;;  %v372_v46 = vld [vmem:[%s2520_s9 + $0x28] sm:$0xff] }
  0x4d   : >> { %v441_v10 = vmul.f32 %v2527_v7, %v368_v1  ;;  %v2531_v11 = vstv %s586_s15  ;;  %v442_v12 = vmul.f32 %v2527_v7, %v369_v2  ;;  %v443_v21 = vmul.f32 %v2527_v7, %v370_v5  ;;  %v1028_v51 = vld [vmem:[%s2520_s9 + $0x23] sm:$0xff] }
  0x4e   : >> { %v660_v15 = vmul.f32 %v2531_v11, %v587_v3  ;;  %v2537_v16 = vstv %s805_s18  ;;  %v661_v18 = vmul.f32 %v2531_v11, %v588_v4  ;;  %v662_v31 = vmul.f32 %v2531_v11, %v589_v14  ;;  %v294_v58 = vld [vmem:[#allocation2 + $0xe8] sm:$0xff]  ;;  %v811_v14 = vld [vmem:[%s2520_s9 + $0x32] sm:$0xff] }
  0x4f   : >> { %v513_v22 = vadd.f32 %v441_v10, %v290_v6  ;;  %v879_v23 = vmul.f32 %v2537_v16, %v806_v8  ;;  %v2544_v24 = vstv %s1024_s20  ;;  %v514_v26 = vadd.f32 %v442_v12, %v291_v9  ;;  %v1247_v3 = vld [vmem:[%s2520_s9 + $0x24] sm:$0xff] }
  0x50   : >> { %v2549_v29 = vstv %s1243_s22  ;;  %v880_v30 = vmul.f32 %v2537_v16, %v807_v13  ;;  %v1098_v35 = vmul.f32 %v2544_v24, %v1025_v17  ;;  %v1099_v37 = vmul.f32 %v2544_v24, %v1026_v19  ;;  %v1029_v6 = vld [vmem:[%s2520_s9 + $0x2b] sm:$0xff] }
  0x51   : >> { %v732_v34 = vadd.f32 %v660_v15, %v513_v22  ;;  %v733_v36 = vadd.f32 %v661_v18, %v514_v26  ;;  %v1317_v41 = vmul.f32 %v2549_v29, %v1244_v25  ;;  %v1318_v42 = vmul.f32 %v2549_v29, %v1245_v27  ;;  %v295_v13 = vld [vmem:[#allocation2 + $0xf0] sm:$0xff]  ;;  %v374_v15 = vld [vmem:[%s2520_s9 + $0x40] sm:$0xff] }
  0x52   : >> { %v515_v43 = vadd.f32 %v443_v21, %v292_v20  ;;  %v881_v44 = vmul.f32 %v2537_v16, %v808_v28  ;;  %v444_v49 = vmul.f32 %v2527_v7, %v371_v32  ;;  %v663_v50 = vmul.f32 %v2531_v11, %v590_v33  ;;  %v1248_v18 = vld [vmem:[%s2520_s9 + $0x2c] sm:$0xff]  ;;  %v593_v21 = vld [vmem:[%s2520_s9 + $0x41] sm:$0xff] }
  0x53   : >> { %v951_v47 = vadd.f32 %v879_v23, %v732_v34  ;;  %v952_v48 = vadd.f32 %v880_v30, %v733_v36  ;;  %v1100_v55 = vmul.f32 %v2544_v24, %v1027_v38  ;;  %v1319_v56 = vmul.f32 %v2549_v29, %v1246_v39  ;;  %v1030_v27 = vld [vmem:[%s2520_s9 + $0x33] sm:$0xff]  ;;  %v812_v30 = vld [vmem:[%s2520_s9 + $0x42] sm:$0xff] }
  0x54   : >> { %v734_v54 = vadd.f32 %v662_v31, %v515_v43  ;;  %v882_v57 = vmul.f32 %v2537_v16, %v809_v40  ;;  %v516_v61 = vadd.f32 %v444_v49, %v293_v45  ;;  %v445_v62 = vmul.f32 %v2527_v7, %v372_v46  ;;  %v296_v28 = vld [vmem:[#allocation2 + $0x70] sm:$0xff] }
  0x55   : >> { %v1170_v59 = vadd.f32 %v1098_v35, %v951_v47  ;;  %v1171_v60 = vadd.f32 %v1099_v37, %v952_v48  ;;  %v1101_v2 = vmul.f32 %v2544_v24, %v1028_v51  ;;  %v664_v4 = vmul.f32 %v2531_v11, %v591_v52  ;;  %v375_v35 = vld [vmem:[%s2520_s9 + $0x48] sm:$0xff]  ;;  %v1249_v40 = vld [vmem:[%s2520_s9 + $0x34] sm:$0xff]  ;;  %v297_v47 = vld [vmem:[#allocation2 + $0x120] sm:$0xff] }
  0x56   : >> { %v953_v1 = vadd.f32 %v881_v44, %v734_v54  ;;  %v883_v5 = vmul.f32 %v2537_v16, %v810_v53  ;;  %v735_v10 = vadd.f32 %v663_v50, %v516_v61  ;;  %v517_v12 = vadd.f32 %v445_v62, %v294_v58  ;;  %v594_v36 = vld [vmem:[%s2520_s9 + $0x49] sm:$0xff]  ;;  %v298_v61 = vld [vmem:[#allocation2 + $0xd8] sm:$0xff] }
  0x57   : >> { %v1389_v8 = vadd.f32 %v1317_v41, %v1170_v59  ;;  %v1390_v9 = vadd.f32 %v1318_v42, %v1171_v60  ;;  %v446_v19 = vmul.f32 %v2527_v7, %v373_v63  ;;  %v665_v20 = vmul.f32 %v2531_v11, %v592_v0  ;;  %v1031_v42 = vld [vmem:[%s2520_s9 + $0x43] sm:$0xff]  ;;  %v376_v49 = vld [vmem:[%s2520_s9 + $0x50] sm:$0xff] }
  0x58   : >> { %v1172_v17 = vadd.f32 %v1100_v55, %v953_v1  ;;  %v954_v22 = vadd.f32 %v882_v57, %v735_v10  ;;  %v1320_v23 = vmul.f32 %v2549_v29, %v1247_v3  ;;  %v736_v25 = vadd.f32 %v664_v4, %v517_v12  ;;  %v813_v48 = vld [vmem:[%s2520_s9 + $0x4a] sm:$0xff]  ;;  %v814_v62 = vld [vmem:[%s2520_s9 + $0x52] sm:$0xff]  ;;  %v377_v3 = vld [vmem:[%s2520_s9 + $0x60] sm:$0xff] }
  0x59   : >> { %1461 = vst [vmem:[#allocation2 + $0xc8] sm:$0xff] %v1389_v8  ;;  %1462 = vst [vmem:[#allocation2 + $0x8] sm:$0xff] %v1390_v9  ;;  %v1102_v26 = vmul.f32 %v2544_v24, %v1029_v6  ;;  %v518_v32 = vadd.f32 %v446_v19, %v295_v13  ;;  %v884_v33 = vmul.f32 %v2537_v16, %v811_v14  ;;  %v1250_v52 = vld [vmem:[%s2520_s9 + $0x44] sm:$0xff]  ;;  %v595_v55 = vld [vmem:[%s2520_s9 + $0x51] sm:$0xff] }
  0x5a   : >> { %v1391_v31 = vadd.f32 %v1319_v56, %v1172_v17  ;;  %v447_v34 = vmul.f32 %v2527_v7, %v374_v15  ;;  %v1173_v37 = vadd.f32 %v1101_v2, %v954_v22  ;;  %v955_v38 = vadd.f32 %v883_v5, %v736_v25  ;;  %v1032_v60 = vld [vmem:[%s2520_s9 + $0x4b] sm:$0xff]  ;;  %v596_v4 = vld [vmem:[%s2520_s9 + $0x61] sm:$0xff]  ;;  %v1033_v12 = vld [vmem:[%s2520_s9 + $0x53] sm:$0xff] }
  0x5b   : >> { %v1321_v39 = vmul.f32 %v2549_v29, %v1248_v18  ;;  %v666_v41 = vmul.f32 %v2531_v11, %v593_v21  ;;  %v737_v43 = vadd.f32 %v665_v20, %v518_v32  ;;  %v1103_v44 = vmul.f32 %v2544_v24, %v1030_v27  ;;  %v1251_v9 = vld [vmem:[%s2520_s9 + $0x4c] sm:$0xff]  ;;  %v299_v18 = vld [vmem:[#allocation2 + $0x18] sm:$0xff]  ;;  %v815_v19 = vld [vmem:[%s2520_s9 + $0x62] sm:$0xff] }
  0x5c   : >> { %1463 = vst [vmem:[#allocation2 + $0x40] sm:$0xff] %v1391_v31  ;;  %v519_v45 = vadd.f32 %v447_v34, %v296_v28  ;;  %v885_v46 = vmul.f32 %v2537_v16, %v812_v30  ;;  %v1392_v50 = vadd.f32 %v1320_v23, %v1173_v37  ;;  %v1174_v51 = vadd.f32 %v1102_v26, %v955_v38  ;;  %v378_v20 = vld [vmem:[%s2520_s9 + $0x68] sm:$0xff]  ;;  %v1252_v23 = vld [vmem:[%s2520_s9 + $0x54] sm:$0xff] }
  0x5d   : >> { %v448_v53 = vmul.f32 %v2527_v7, %v375_v35  ;;  %v667_v54 = vmul.f32 %v2531_v11, %v594_v36  ;;  %v956_v56 = vadd.f32 %v884_v33, %v737_v43  ;;  %v1322_v57 = vmul.f32 %v2549_v29, %v1249_v40  ;;  %v597_v27 = vld [vmem:[%s2520_s9 + $0x69] sm:$0xff] }
  0x5e   : >> { %v738_v58 = vadd.f32 %v666_v41, %v519_v45  ;;  %v1104_v59 = vmul.f32 %v2544_v24, %v1031_v42  ;;  %1464 = vst [vmem:[#allocation2 + $0x28] sm:$0xff] %v1392_v50  ;;  %v1393_v63 = vadd.f32 %v1321_v39, %v1174_v51  ;;  %v886_v1 = vmul.f32 %v2537_v16, %v813_v48  ;;  %v1034_v33 = vld [vmem:[%s2520_s9 + $0x63] sm:$0xff]  ;;  %v300_v34 = vld [vmem:[#allocation2 + $0xb0] sm:$0xff] }
  0x5f   : >> { %v520_v0 = vadd.f32 %v448_v53, %v297_v47  ;;  %v449_v2 = vmul.f32 %v2527_v7, %v376_v49  ;;  %v1175_v5 = vadd.f32 %v1103_v44, %v956_v56  ;;  %v1323_v8 = vmul.f32 %v2549_v29, %v1250_v52  ;;  %v816_v35 = vld [vmem:[%s2520_s9 + $0x6a] sm:$0xff]  ;;  %v301_v52 = vld [vmem:[#allocation2 + $0x158] sm:$0xff] }
  0x60   : >> { %v957_v6 = vadd.f32 %v885_v46, %v738_v58  ;;  %v668_v10 = vmul.f32 %v2531_v11, %v595_v55  ;;  %1465 = vst [vmem:[#allocation2 + $0xe8] sm:$0xff] %v1393_v63  ;;  %v1105_v14 = vmul.f32 %v2544_v24, %v1032_v60  ;;  %v887_v17 = vmul.f32 %v2537_v16, %v814_v62  ;;  %v379_v40 = vld [vmem:[%s2520_s9 + $0x70] sm:$0xff]  ;;  %v1253_v45 = vld [vmem:[%s2520_s9 + $0x64] sm:$0xff] }
  0x61   : >> { %v739_v13 = vadd.f32 %v667_v54, %v520_v0  ;;  %v521_v15 = vadd.f32 %v449_v2, %v298_v61  ;;  %v1394_v21 = vadd.f32 %v1322_v57, %v1175_v5  ;;  %v450_v25 = vmul.f32 %v2527_v7, %v377_v3  ;;  %v598_v41 = vld [vmem:[%s2520_s9 + $0x71] sm:$0xff]  ;;  %v380_v54 = vld [vmem:[%s2520_s9 + $0x80] sm:$0xff]  ;;  %v302_v2 = vld [vmem:[#allocation2 + $0x108] sm:$0xff] }
  0x62   : >> { %v1176_v22 = vadd.f32 %v1104_v59, %v957_v6  ;;  %v669_v26 = vmul.f32 %v2531_v11, %v596_v4  ;;  %v1324_v30 = vmul.f32 %v2549_v29, %v1251_v9  ;;  %v1106_v32 = vmul.f32 %v2544_v24, %v1033_v12  ;;  %v1035_v47 = vld [vmem:[%s2520_s9 + $0x6b] sm:$0xff]  ;;  %v599_v60 = vld [vmem:[%s2520_s9 + $0x81] sm:$0xff] }
  0x63   : >> { %v958_v28 = vadd.f32 %v886_v1, %v739_v13  ;;  %v740_v31 = vadd.f32 %v668_v10, %v521_v15  ;;  %1466 = vst [vmem:[#allocation2 + $0xf0] sm:$0xff] %v1394_v21  ;;  %v522_v37 = vadd.f32 %v450_v25, %v299_v18  ;;  %v888_v38 = vmul.f32 %v2537_v16, %v815_v19  ;;  %v817_v53 = vld [vmem:[%s2520_s9 + $0x72] sm:$0xff]  ;;  %v818_v3 = vld [vmem:[%s2520_s9 + $0x82] sm:$0xff]  ;;  %v819_v25 = vld [vmem:[%s2520_s9 + $0x8a] sm:$0xff] }
  0x64   : >> { %v1395_v36 = vadd.f32 %v1323_v8, %v1176_v22  ;;  %v451_v39 = vmul.f32 %v2527_v7, %v378_v20  ;;  %v1325_v44 = vmul.f32 %v2549_v29, %v1252_v23  ;;  %v670_v46 = vmul.f32 %v2531_v11, %v597_v27  ;;  %v1254_v57 = vld [vmem:[%s2520_s9 + $0x6c] sm:$0xff]  ;;  %v1255_v15 = vld [vmem:[%s2520_s9 + $0x74] sm:$0xff]  ;;  %v1037_v18 = vld [vmem:[%s2520_s9 + $0x83] sm:$0xff] }
  0x65   : >> { %v1177_v42 = vadd.f32 %v1105_v14, %v958_v28  ;;  %v959_v43 = vadd.f32 %v887_v17, %v740_v31  ;;  %v741_v48 = vadd.f32 %v669_v26, %v522_v37  ;;  %v1107_v49 = vmul.f32 %v2544_v24, %v1034_v33  ;;  %v1036_v1 = vld [vmem:[%s2520_s9 + $0x73] sm:$0xff]  ;;  %v381_v9 = vld [vmem:[%s2520_s9 + $0x88] sm:$0xff] }
  0x66   : >> { %1467 = vst [vmem:[#allocation2 + $0x70] sm:$0xff] %v1395_v36  ;;  %v523_v50 = vadd.f32 %v451_v39, %v300_v34  ;;  %v889_v51 = vmul.f32 %v2537_v16, %v816_v35  ;;  %v452_v58 = vmul.f32 %v2527_v7, %v379_v40  ;;  %v671_v59 = vmul.f32 %v2531_v11, %v598_v41  ;;  %v600_v10 = vld [vmem:[%s2520_s9 + $0x89] sm:$0xff]  ;;  %v601_v33 = vld [vmem:[%s2520_s9 + $0x91] sm:$0xff] }
  0x67   : >> { %v1396_v55 = vadd.f32 %v1324_v30, %v1177_v42  ;;  %v1178_v56 = vadd.f32 %v1106_v32, %v959_v43  ;;  %v960_v61 = vadd.f32 %v888_v38, %v741_v48  ;;  %v1326_v62 = vmul.f32 %v2549_v29, %v1253_v45  ;;  %v303_v23 = vld [vmem:[#allocation2 + $0x110] sm:$0xff]  ;;  %v1256_v30 = vld [vmem:[%s2520_s9 + $0x84] sm:$0xff]  ;;  %v304_v39 = vld [vmem:[#allocation2 + $0x1f8] sm:$0xff] }
  0x68   : >> { %v742_v63 = vadd.f32 %v670_v46, %v523_v50  ;;  %v1108_v0 = vmul.f32 %v2544_v24, %v1035_v47  ;;  %v524_v5 = vadd.f32 %v452_v58, %v301_v52  ;;  %v890_v6 = vmul.f32 %v2537_v16, %v817_v53  ;;  %v382_v26 = vld [vmem:[%s2520_s9 + $0x90] sm:$0xff]  ;;  %v383_v45 = vld [vmem:[%s2520_s9 + $0xa0] sm:$0xff] }
  0x69   : >> { %1468 = vst [vmem:[#allocation2 + $0x120] sm:$0xff] %v1396_v55  ;;  %v1397_v4 = vadd.f32 %v1325_v44, %v1178_v56  ;;  %v453_v8 = vmul.f32 %v2527_v7, %v380_v54  ;;  %v1179_v12 = vadd.f32 %v1107_v49, %v960_v61  ;;  %v1327_v14 = vmul.f32 %v2549_v29, %v1254_v57  ;;  %v1038_v38 = vld [vmem:[%s2520_s9 + $0x8b] sm:$0xff]  ;;  %v602_v46 = vld [vmem:[%s2520_s9 + $0xa1] sm:$0xff]  ;;  %v1039_v52 = vld [vmem:[%s2520_s9 + $0x93] sm:$0xff] }
  0x6a   : >> { %v961_v13 = vadd.f32 %v889_v51, %v742_v63  ;;  %v672_v17 = vmul.f32 %v2531_v11, %v599_v60  ;;  %v743_v19 = vadd.f32 %v671_v59, %v524_v5  ;;  %v1109_v20 = vmul.f32 %v2544_v24, %v1036_v1  ;;  %v820_v40 = vld [vmem:[%s2520_s9 + $0x92] sm:$0xff]  ;;  %v821_v58 = vld [vmem:[%s2520_s9 + $0xa2] sm:$0xff] }
  0x6b   : >> { %1469 = vst [vmem:[#allocation2 + $0xd8] sm:$0xff] %v1397_v4  ;;  %v525_v21 = vadd.f32 %v453_v8, %v302_v2  ;;  %v891_v22 = vmul.f32 %v2537_v16, %v818_v3  ;;  %v1398_v27 = vadd.f32 %v1326_v62, %v1179_v12  ;;  %v454_v31 = vmul.f32 %v2527_v7, %v381_v9  ;;  %v1257_v50 = vld [vmem:[%s2520_s9 + $0x8c] sm:$0xff]  ;;  %v305_v57 = vld [vmem:[#allocation2 + $0xb8] sm:$0xff]  ;;  %v306_v8 = vld [vmem:[#allocation2 + $0x180] sm:$0xff] }
  0x6c   : >> { %v1180_v28 = vadd.f32 %v1108_v0, %v961_v13  ;;  %v673_v32 = vmul.f32 %v2531_v11, %v600_v10  ;;  %v962_v34 = vadd.f32 %v890_v6, %v743_v19  ;;  %v1328_v35 = vmul.f32 %v2549_v29, %v1255_v15  ;;  %v384_v59 = vld [vmem:[%s2520_s9 + $0xa8] sm:$0xff]  ;;  %v1258_v62 = vld [vmem:[%s2520_s9 + $0x94] sm:$0xff] }
  0x6d   : >> { %v744_v36 = vadd.f32 %v672_v17, %v525_v21  ;;  %v1110_v37 = vmul.f32 %v2544_v24, %v1037_v18  ;;  %1470 = vst [vmem:[#allocation2 + $0x18] sm:$0xff] %v1398_v27  ;;  %v526_v42 = vadd.f32 %v454_v31, %v303_v23  ;;  %v892_v43 = vmul.f32 %v2537_v16, %v819_v25  ;;  %v603_v1 = vld [vmem:[%s2520_s9 + $0xa9] sm:$0xff]  ;;  %v604_v17 = vld [vmem:[%s2520_s9 + $0xb1] sm:$0xff] }
  0x6e   : >> { %v1399_v41 = vadd.f32 %v1327_v14, %v1180_v28  ;;  %v455_v44 = vmul.f32 %v2527_v7, %v382_v26  ;;  %v1181_v47 = vadd.f32 %v1109_v20, %v962_v34  ;;  %v1329_v49 = vmul.f32 %v2549_v29, %v1256_v30  ;;  %v1040_v6 = vld [vmem:[%s2520_s9 + $0xa3] sm:$0xff]  ;;  %v385_v15 = vld [vmem:[%s2520_s9 + $0xb0] sm:$0xff] }
  0x6f   : >> { %v963_v48 = vadd.f32 %v891_v22, %v744_v36  ;;  %v674_v51 = vmul.f32 %v2531_v11, %v601_v33  ;;  %v745_v53 = vadd.f32 %v673_v32, %v526_v42  ;;  %v1111_v54 = vmul.f32 %v2544_v24, %v1038_v38  ;;  %v822_v9 = vld [vmem:[%s2520_s9 + $0xaa] sm:$0xff]  ;;  %v823_v31 = vld [vmem:[%s2520_s9 + $0xb2] sm:$0xff]  ;;  %v386_v32 = vld [vmem:[%s2520_s9 + $0xc0] sm:$0xff] }
  0x70   : >> { %1471 = vst [vmem:[#allocation2 + $0xb0] sm:$0xff] %v1399_v41  ;;  %v527_v55 = vadd.f32 %v455_v44, %v304_v39  ;;  %v893_v56 = vmul.f32 %v2537_v16, %v820_v40  ;;  %v1400_v60 = vadd.f32 %v1328_v35, %v1181_v47  ;;  %v456_v63 = vmul.f32 %v2527_v7, %v383_v45  ;;  %v1259_v21 = vld [vmem:[%s2520_s9 + $0xa4] sm:$0xff]  ;;  %v307_v30 = vld [vmem:[#allocation2 + $0x190] sm:$0xff] }
  0x71   : >> { %v1182_v61 = vadd.f32 %v1110_v37, %v963_v48  ;;  %v675_v0 = vmul.f32 %v2531_v11, %v602_v46  ;;  %v964_v2 = vadd.f32 %v892_v43, %v745_v53  ;;  %v1330_v3 = vmul.f32 %v2549_v29, %v1257_v50  ;;  %v1041_v23 = vld [vmem:[%s2520_s9 + $0xab] sm:$0xff]  ;;  %v605_v38 = vld [vmem:[%s2520_s9 + $0xc1] sm:$0xff]  ;;  %v1042_v43 = vld [vmem:[%s2520_s9 + $0xb3] sm:$0xff] }
  0x72   : >> { %v746_v4 = vadd.f32 %v674_v51, %v527_v55  ;;  %v1112_v5 = vmul.f32 %v2544_v24, %v1039_v52  ;;  %1472 = vst [vmem:[#allocation2 + $0x158] sm:$0xff] %v1400_v60  ;;  %v528_v12 = vadd.f32 %v456_v63, %v305_v57  ;;  %v894_v13 = vmul.f32 %v2537_v16, %v821_v58  ;;  %v1260_v35 = vld [vmem:[%s2520_s9 + $0xac] sm:$0xff]  ;;  %v308_v44 = vld [vmem:[#allocation2 + $0x140] sm:$0xff]  ;;  %v1261_v55 = vld [vmem:[%s2520_s9 + $0xb4] sm:$0xff] }
  0x73   : >> { %v1401_v10 = vadd.f32 %v1329_v49, %v1182_v61  ;;  %v457_v14 = vmul.f32 %v2527_v7, %v384_v59  ;;  %v1183_v18 = vadd.f32 %v1111_v54, %v964_v2  ;;  %v1331_v20 = vmul.f32 %v2549_v29, %v1258_v62  ;;  %v824_v45 = vld [vmem:[%s2520_s9 + $0xc2] sm:$0xff]  ;;  %v825_v63 = vld [vmem:[%s2520_s9 + $0xca] sm:$0xff] }
  0x74   : >> { %v965_v19 = vadd.f32 %v893_v56, %v746_v4  ;;  %v676_v22 = vmul.f32 %v2531_v11, %v603_v1  ;;  %v747_v25 = vadd.f32 %v675_v0, %v528_v12  ;;  %v1113_v26 = vmul.f32 %v2544_v24, %v1040_v6  ;;  %v387_v50 = vld [vmem:[%s2520_s9 + $0xc8] sm:$0xff]  ;;  %v309_v62 = vld [vmem:[#allocation2 + $0x1c0] sm:$0xff]  ;;  %v388_v0 = vld [vmem:[%s2520_s9 + $0xd0] sm:$0xff] }
  0x75   : >> { %1473 = vst [vmem:[#allocation2 + $0x108] sm:$0xff] %v1401_v10  ;;  %v529_v27 = vadd.f32 %v457_v14, %v306_v8  ;;  %v895_v28 = vmul.f32 %v2537_v16, %v822_v9  ;;  %v1402_v33 = vadd.f32 %v1330_v3, %v1183_v18  ;;  %v458_v36 = vmul.f32 %v2527_v7, %v385_v15  ;;  %v606_v51 = vld [vmem:[%s2520_s9 + $0xc9] sm:$0xff]  ;;  %v607_v6 = vld [vmem:[%s2520_s9 + $0xd1] sm:$0xff] }
  0x76   : >> { %v1184_v34 = vadd.f32 %v1112_v5, %v965_v19  ;;  %v677_v37 = vmul.f32 %v2531_v11, %v604_v17  ;;  %v966_v39 = vadd.f32 %v894_v13, %v747_v25  ;;  %v1332_v40 = vmul.f32 %v2549_v29, %v1259_v21  ;;  %v1043_v57 = vld [vmem:[%s2520_s9 + $0xc3] sm:$0xff]  ;;  %v1044_v13 = vld [vmem:[%s2520_s9 + $0xcb] sm:$0xff] }
  0x77   : >> { %v748_v41 = vadd.f32 %v676_v22, %v529_v27  ;;  %v1114_v42 = vmul.f32 %v2544_v24, %v1041_v23  ;;  %1474 = vst [vmem:[#allocation2 + $0x110] sm:$0xff] %v1402_v33  ;;  %v530_v47 = vadd.f32 %v458_v36, %v307_v30  ;;  %v896_v48 = vmul.f32 %v2537_v16, %v823_v31  ;;  %v1262_v3 = vld [vmem:[%s2520_s9 + $0xc4] sm:$0xff]  ;;  %v310_v14 = vld [vmem:[#allocation2 + $0xd0] sm:$0xff] }
  0x78   : >> { %v1403_v46 = vadd.f32 %v1331_v20, %v1184_v34  ;;  %v459_v49 = vmul.f32 %v2527_v7, %v386_v32  ;;  %v1185_v52 = vadd.f32 %v1113_v26, %v966_v39  ;;  %v1333_v54 = vmul.f32 %v2549_v29, %v1260_v35  ;;  %v826_v15 = vld [vmem:[%s2520_s9 + $0xd2] sm:$0xff]  ;;  %v389_v21 = vld [vmem:[%s2520_s9 + $0xe0] sm:$0xff] }
  0x79   : >> { %v967_v53 = vadd.f32 %v895_v28, %v748_v41  ;;  %v678_v56 = vmul.f32 %v2531_v11, %v605_v38  ;;  %v749_v58 = vadd.f32 %v677_v37, %v530_v47  ;;  %v1115_v59 = vmul.f32 %v2544_v24, %v1042_v43  ;;  %v608_v22 = vld [vmem:[%s2520_s9 + $0xe1] sm:$0xff]  ;;  %v1263_v27 = vld [vmem:[%s2520_s9 + $0xcc] sm:$0xff]  ;;  %v311_v35 = vld [vmem:[#allocation2 + $0x138] sm:$0xff] }
  0x7a   : >> { %1475 = vst [vmem:[#allocation2 + $0x1f8] sm:$0xff] %v1403_v46  ;;  %v531_v60 = vadd.f32 %v459_v49, %v308_v44  ;;  %v897_v61 = vmul.f32 %v2537_v16, %v824_v45  ;;  %v1404_v1 = vadd.f32 %v1332_v40, %v1185_v52  ;;  %v460_v4 = vmul.f32 %v2527_v7, %v387_v50  ;;  %v1045_v30 = vld [vmem:[%s2520_s9 + $0xd3] sm:$0xff]  ;;  %v827_v36 = vld [vmem:[%s2520_s9 + $0xe2] sm:$0xff]  ;;  %v828_v50 = vld [vmem:[%s2520_s9 + $0xea] sm:$0xff] }
  0x7b   : >> { %v1186_v2 = vadd.f32 %v1114_v42, %v967_v53  ;;  %v679_v5 = vmul.f32 %v2531_v11, %v606_v51  ;;  %v968_v8 = vadd.f32 %v896_v48, %v749_v58  ;;  %v1334_v9 = vmul.f32 %v2549_v29, %v1261_v55  ;;  %v390_v37 = vld [vmem:[%s2520_s9 + $0xe8] sm:$0xff]  ;;  %v1264_v40 = vld [vmem:[%s2520_s9 + $0xd4] sm:$0xff]  ;;  %v312_v49 = vld [vmem:[#allocation2 + $0x60] sm:$0xff] }
  0x7c   : >> { %v750_v10 = vadd.f32 %v678_v56, %v531_v60  ;;  %v1116_v12 = vmul.f32 %v2544_v24, %v1043_v57  ;;  %1476 = vst [vmem:[#allocation2 + $0xb8] sm:$0xff] %v1404_v1  ;;  %v532_v18 = vadd.f32 %v460_v4, %v309_v62  ;;  %v898_v19 = vmul.f32 %v2537_v16, %v825_v63  ;;  %v609_v43 = vld [vmem:[%s2520_s9 + $0xe9] sm:$0xff]  ;;  %v610_v56 = vld [vmem:[%s2520_s9 + $0xf1] sm:$0xff] }
  0x7d   : >> { %v1405_v17 = vadd.f32 %v1333_v54, %v1186_v2  ;;  %v461_v20 = vmul.f32 %v2527_v7, %v388_v0  ;;  %v1187_v23 = vadd.f32 %v1115_v59, %v968_v8  ;;  %v1335_v26 = vmul.f32 %v2549_v29, %v1262_v3  ;;  %v1046_v48 = vld [vmem:[%s2520_s9 + $0xe3] sm:$0xff]  ;;  %v391_v55 = vld [vmem:[%s2520_s9 + $0xf0] sm:$0xff]  ;;  %v313_v3 = vld [vmem:[#allocation2 + $0x1b8] sm:$0xff] }
  0x7e   : >> { %v969_v25 = vadd.f32 %v897_v61, %v750_v10  ;;  %v680_v28 = vmul.f32 %v2531_v11, %v607_v6  ;;  %v751_v31 = vadd.f32 %v679_v5, %v532_v18  ;;  %v1117_v32 = vmul.f32 %v2544_v24, %v1044_v13  ;;  %v1265_v60 = vld [vmem:[%s2520_s9 + $0xe4] sm:$0xff]  ;;  %v829_v4 = vld [vmem:[%s2520_s9 + $0xf2] sm:$0xff] }
  0x7f   : >> { %1477 = vst [vmem:[#allocation2 + $0x180] sm:$0xff] %v1405_v17  ;;  %v533_v33 = vadd.f32 %v461_v20, %v310_v14  ;;  %v899_v34 = vmul.f32 %v2537_v16, %v826_v15  ;;  %v1406_v38 = vadd.f32 %v1334_v9, %v1187_v23  ;;  %v462_v41 = vmul.f32 %v2527_v7, %v389_v21  ;;  %v1047_v62 = vld [vmem:[%s2520_s9 + $0xeb] sm:$0xff]  ;;  %v392_v5 = vld [vmem:[%s2520_s9 + $0x100] sm:$0xff] }
  0x80   : >> { %v1188_v39 = vadd.f32 %v1116_v12, %v969_v25  ;;  %v681_v42 = vmul.f32 %v2531_v11, %v608_v22  ;;  %v970_v44 = vadd.f32 %v898_v19, %v751_v31  ;;  %v1336_v45 = vmul.f32 %v2549_v29, %v1263_v27  ;;  %v1266_v9 = vld [vmem:[%s2520_s9 + $0xec] sm:$0xff]  ;;  %v611_v13 = vld [vmem:[%s2520_s9 + $0x101] sm:$0xff] }
  0x81   : >> { %v752_v46 = vadd.f32 %v680_v28, %v533_v33  ;;  %v1118_v47 = vmul.f32 %v2544_v24, %v1045_v30  ;;  %1478 = vst [vmem:[#allocation2 + $0x190] sm:$0xff] %v1406_v38  ;;  %v534_v52 = vadd.f32 %v462_v41, %v311_v35  ;;  %v900_v53 = vmul.f32 %v2537_v16, %v827_v36  ;;  %v1048_v19 = vld [vmem:[%s2520_s9 + $0xf3] sm:$0xff]  ;;  %v314_v20 = vld [vmem:[#allocation2 + $0x88] sm:$0xff] }
  0x82   : >> { %v1407_v51 = vadd.f32 %v1335_v26, %v1188_v39  ;;  %v463_v54 = vmul.f32 %v2527_v7, %v390_v37  ;;  %v1189_v57 = vadd.f32 %v1117_v32, %v970_v44  ;;  %v1337_v59 = vmul.f32 %v2549_v29, %v1264_v40  ;;  %v830_v21 = vld [vmem:[%s2520_s9 + $0x102] sm:$0xff]  ;;  %v1267_v33 = vld [vmem:[%s2520_s9 + $0xf4] sm:$0xff]  ;;  %v831_v41 = vld [vmem:[%s2520_s9 + $0x10a] sm:$0xff] }
  0x83   : >> { %v971_v58 = vadd.f32 %v899_v34, %v752_v46  ;;  %v682_v61 = vmul.f32 %v2531_v11, %v609_v43  ;;  %v753_v63 = vadd.f32 %v681_v42, %v534_v52  ;;  %v1119_v0 = vmul.f32 %v2544_v24, %v1046_v48  ;;  %v393_v27 = vld [vmem:[%s2520_s9 + $0x108] sm:$0xff]  ;;  %v315_v40 = vld [vmem:[#allocation2] sm:$0xff]  ;;  %v394_v42 = vld [vmem:[%s2520_s9 + $0x110] sm:$0xff] }
  0x84   : >> { %1479 = vst [vmem:[#allocation2 + $0x140] sm:$0xff] %v1407_v51  ;;  %v535_v1 = vadd.f32 %v463_v54, %v312_v49  ;;  %v901_v2 = vmul.f32 %v2537_v16, %v828_v50  ;;  %v1408_v6 = vadd.f32 %v1336_v45, %v1189_v57  ;;  %v464_v10 = vmul.f32 %v2527_v7, %v391_v55  ;;  %v612_v28 = vld [vmem:[%s2520_s9 + $0x109] sm:$0xff]  ;;  %v613_v48 = vld [vmem:[%s2520_s9 + $0x111] sm:$0xff] }
  0x85   : >> { %v1190_v8 = vadd.f32 %v1118_v47, %v971_v58  ;;  %v683_v12 = vmul.f32 %v2531_v11, %v610_v56  ;;  %v972_v14 = vadd.f32 %v900_v53, %v753_v63  ;;  %v1338_v15 = vmul.f32 %v2549_v29, %v1265_v60  ;;  %v1049_v35 = vld [vmem:[%s2520_s9 + $0x103] sm:$0xff]  ;;  %v1050_v53 = vld [vmem:[%s2520_s9 + $0x10b] sm:$0xff] }
  0x86   : >> { %v754_v17 = vadd.f32 %v682_v61, %v535_v1  ;;  %v1120_v18 = vmul.f32 %v2544_v24, %v1047_v62  ;;  %1480 = vst [vmem:[#allocation2 + $0x1c0] sm:$0xff] %v1408_v6  ;;  %v536_v23 = vadd.f32 %v464_v10, %v313_v3  ;;  %v902_v25 = vmul.f32 %v2537_v16, %v829_v4  ;;  %v1268_v45 = vld [vmem:[%s2520_s9 + $0x104] sm:$0xff]  ;;  %v832_v55 = vld [vmem:[%s2520_s9 + $0x112] sm:$0xff] }
  0x87   : >> { %v1409_v22 = vadd.f32 %v1337_v59, %v1190_v8  ;;  %v465_v26 = vmul.f32 %v2527_v7, %v392_v5  ;;  %v1191_v30 = vadd.f32 %v1119_v0, %v972_v14  ;;  %v1339_v32 = vmul.f32 %v2549_v29, %v1266_v9  ;;  %v316_v54 = vld [vmem:[#allocation2 + $0x188] sm:$0xff]  ;;  %v395_v60 = vld [vmem:[%s2520_s9 + $0x120] sm:$0xff]  ;;  %v1051_v3 = vld [vmem:[%s2520_s9 + $0x113] sm:$0xff] }
  0x88   : >> { %v973_v31 = vadd.f32 %v901_v2, %v754_v17  ;;  %v684_v34 = vmul.f32 %v2531_v11, %v611_v13  ;;  %v755_v36 = vadd.f32 %v683_v12, %v536_v23  ;;  %v1121_v37 = vmul.f32 %v2544_v24, %v1048_v19  ;;  %v614_v61 = vld [vmem:[%s2520_s9 + $0x121] sm:$0xff]  ;;  %v1269_v1 = vld [vmem:[%s2520_s9 + $0x10c] sm:$0xff]  ;;  %v317_v9 = vld [vmem:[#allocation2 + $0x38] sm:$0xff] }
  0x89   : >> { %1481 = vst [vmem:[#allocation2 + $0xd0] sm:$0xff] %v1409_v22  ;;  %v537_v38 = vadd.f32 %v465_v26, %v314_v20  ;;  %v903_v39 = vmul.f32 %v2537_v16, %v830_v21  ;;  %v1410_v43 = vadd.f32 %v1338_v15, %v1191_v30  ;;  %v466_v46 = vmul.f32 %v2527_v7, %v393_v27  ;;  %v833_v10 = vld [vmem:[%s2520_s9 + $0x122] sm:$0xff]  ;;  %v1270_v15 = vld [vmem:[%s2520_s9 + $0x114] sm:$0xff]  ;;  %v834_v27 = vld [vmem:[%s2520_s9 + $0x12a] sm:$0xff] }
  0x8a   : >> { %v1192_v44 = vadd.f32 %v1120_v18, %v973_v31  ;;  %v685_v47 = vmul.f32 %v2531_v11, %v612_v28  ;;  %v974_v49 = vadd.f32 %v902_v25, %v755_v36  ;;  %v1340_v50 = vmul.f32 %v2549_v29, %v1267_v33  ;;  %v396_v12 = vld [vmem:[%s2520_s9 + $0x128] sm:$0xff]  ;;  %v397_v33 = vld [vmem:[%s2520_s9 + $0x130] sm:$0xff] }
  0x8b   : >> { %v756_v51 = vadd.f32 %v684_v34, %v537_v38  ;;  %v1122_v52 = vmul.f32 %v2544_v24, %v1049_v35  ;;  %1482 = vst [vmem:[#allocation2 + $0x138] sm:$0xff] %v1410_v43  ;;  %v538_v57 = vadd.f32 %v466_v46, %v315_v40  ;;  %v904_v58 = vmul.f32 %v2537_v16, %v831_v41  ;;  %v615_v19 = vld [vmem:[%s2520_s9 + $0x129] sm:$0xff]  ;;  %v616_v34 = vld [vmem:[%s2520_s9 + $0x131] sm:$0xff] }
  0x8c   : >> { %v1411_v56 = vadd.f32 %v1339_v32, %v1192_v44  ;;  %v467_v59 = vmul.f32 %v2527_v7, %v394_v42  ;;  %v1193_v62 = vadd.f32 %v1121_v37, %v974_v49  ;;  %v1341_v0 = vmul.f32 %v2549_v29, %v1268_v45  ;;  %v1052_v25 = vld [vmem:[%s2520_s9 + $0x123] sm:$0xff]  ;;  %v1053_v40 = vld [vmem:[%s2520_s9 + $0x12b] sm:$0xff] }
  0x8d   : >> { %v975_v63 = vadd.f32 %v903_v39, %v756_v51  ;;  %v686_v2 = vmul.f32 %v2531_v11, %v613_v48  ;;  %v757_v4 = vadd.f32 %v685_v47, %v538_v57  ;;  %v1123_v5 = vmul.f32 %v2544_v24, %v1050_v53  ;;  %v318_v26 = vld [vmem:[#allocation2 + $0x1a8] sm:$0xff]  ;;  %v319_v45 = vld [vmem:[#allocation2 + $0x220] sm:$0xff]  ;;  %v835_v46 = vld [vmem:[%s2520_s9 + $0x132] sm:$0xff] }
  0x8e   : >> { %1483 = vst [vmem:[#allocation2 + $0x60] sm:$0xff] %v1411_v56  ;;  %v539_v6 = vadd.f32 %v467_v59, %v316_v54  ;;  %v905_v8 = vmul.f32 %v2537_v16, %v832_v55  ;;  %v1412_v13 = vadd.f32 %v1340_v50, %v1193_v62  ;;  %v468_v17 = vmul.f32 %v2527_v7, %v395_v60  ;;  %v1271_v38 = vld [vmem:[%s2520_s9 + $0x124] sm:$0xff]  ;;  %v1272_v50 = vld [vmem:[%s2520_s9 + $0x12c] sm:$0xff] }
  0x8f   : >> { %v1194_v14 = vadd.f32 %v1122_v52, %v975_v63  ;;  %v687_v18 = vmul.f32 %v2531_v11, %v614_v61  ;;  %v976_v20 = vadd.f32 %v904_v58, %v757_v4  ;;  %v1342_v21 = vmul.f32 %v2549_v29, %v1269_v1  ;;  %v398_v47 = vld [vmem:[%s2520_s9 + $0x140] sm:$0xff]  ;;  %v1054_v58 = vld [vmem:[%s2520_s9 + $0x133] sm:$0xff]  ;;  %v320_v59 = vld [vmem:[#allocation2 + $0x1e8] sm:$0xff] }
  0x90   : >> { %v758_v22 = vadd.f32 %v686_v2, %v539_v6  ;;  %v1124_v23 = vmul.f32 %v2544_v24, %v1051_v3  ;;  %1484 = vst [vmem:[#allocation2 + $0x1b8] sm:$0xff] %v1412_v13  ;;  %v540_v30 = vadd.f32 %v468_v17, %v317_v9  ;;  %v906_v31 = vmul.f32 %v2537_v16, %v833_v10  ;;  %v617_v53 = vld [vmem:[%s2520_s9 + $0x141] sm:$0xff]  ;;  %v618_v2 = vld [vmem:[%s2520_s9 + $0x149] sm:$0xff]  ;;  %v1273_v6 = vld [vmem:[%s2520_s9 + $0x134] sm:$0xff] }
  0x91   : >> { %v1413_v28 = vadd.f32 %v1341_v0, %v1194_v14  ;;  %v469_v32 = vmul.f32 %v2527_v7, %v396_v12  ;;  %v1195_v35 = vadd.f32 %v1123_v5, %v976_v20  ;;  %v1343_v37 = vmul.f32 %v2549_v29, %v1270_v15  ;;  %v836_v60 = vld [vmem:[%s2520_s9 + $0x142] sm:$0xff]  ;;  %v837_v17 = vld [vmem:[%s2520_s9 + $0x14a] sm:$0xff] }
  0x92   : >> { %v977_v36 = vadd.f32 %v905_v8, %v758_v22  ;;  %v688_v39 = vmul.f32 %v2531_v11, %v615_v19  ;;  %v759_v41 = vadd.f32 %v687_v18, %v540_v30  ;;  %v1125_v42 = vmul.f32 %v2544_v24, %v1052_v25  ;;  %v399_v1 = vld [vmem:[%s2520_s9 + $0x148] sm:$0xff]  ;;  %v400_v18 = vld [vmem:[%s2520_s9 + $0x150] sm:$0xff] }
  0x93   : >> { %1485 = vst [vmem:[#allocation2 + $0x88] sm:$0xff] %v1413_v28  ;;  %v541_v43 = vadd.f32 %v469_v32, %v318_v26  ;;  %v907_v44 = vmul.f32 %v2537_v16, %v834_v27  ;;  %v1414_v48 = vadd.f32 %v1342_v21, %v1195_v35  ;;  %v470_v51 = vmul.f32 %v2527_v7, %v397_v33  ;;  %v1055_v9 = vld [vmem:[%s2520_s9 + $0x143] sm:$0xff]  ;;  %v619_v25 = vld [vmem:[%s2520_s9 + $0x151] sm:$0xff] }
  0x94   : >> { %v1196_v49 = vadd.f32 %v1124_v23, %v977_v36  ;;  %v689_v52 = vmul.f32 %v2531_v11, %v616_v34  ;;  %v978_v54 = vadd.f32 %v906_v31, %v759_v41  ;;  %v1344_v55 = vmul.f32 %v2549_v29, %v1271_v38  ;;  %v321_v15 = vld [vmem:[#allocation2 + $0x1c8] sm:$0xff]  ;;  %v322_v32 = vld [vmem:[#allocation2 + $0x80] sm:$0xff]  ;;  %v838_v33 = vld [vmem:[%s2520_s9 + $0x152] sm:$0xff] }
  0x95   : >> { %v760_v56 = vadd.f32 %v688_v39, %v541_v43  ;;  %v1126_v57 = vmul.f32 %v2544_v24, %v1053_v40  ;;  %1486 = vst [vmem:[#allocation2] sm:$0xff] %v1414_v48  ;;  %v542_v62 = vadd.f32 %v470_v51, %v319_v45  ;;  %v908_v63 = vmul.f32 %v2537_v16, %v835_v46  ;;  %v1274_v21 = vld [vmem:[%s2520_s9 + $0x144] sm:$0xff]  ;;  %v1275_v43 = vld [vmem:[%s2520_s9 + $0x14c] sm:$0xff] }
  0x96   : >> { %v1415_v61 = vadd.f32 %v1343_v37, %v1196_v49  ;;  %v471_v0 = vmul.f32 %v2527_v7, %v398_v47  ;;  %v1197_v3 = vadd.f32 %v1125_v42, %v978_v54  ;;  %v1345_v5 = vmul.f32 %v2549_v29, %v1272_v50  ;;  %v1056_v31 = vld [vmem:[%s2520_s9 + $0x14b] sm:$0xff]  ;;  %v401_v38 = vld [vmem:[%s2520_s9 + $0x160] sm:$0xff]  ;;  %v1057_v45 = vld [vmem:[%s2520_s9 + $0x153] sm:$0xff] }
  0x97   : >> { %v979_v4 = vadd.f32 %v907_v44, %v760_v56  ;;  %v690_v8 = vmul.f32 %v2531_v11, %v617_v53  ;;  %v761_v10 = vadd.f32 %v689_v52, %v542_v62  ;;  %v1127_v12 = vmul.f32 %v2544_v24, %v1054_v58  ;;  %v620_v39 = vld [vmem:[%s2520_s9 + $0x161] sm:$0xff]  ;;  %v323_v50 = vld [vmem:[#allocation2 + $0xf8] sm:$0xff]  ;;  %v621_v58 = vld [vmem:[%s2520_s9 + $0x169] sm:$0xff] }
  0x98   : >> { %1487 = vst [vmem:[#allocation2 + $0x188] sm:$0xff] %v1415_v61  ;;  %v543_v13 = vadd.f32 %v471_v0, %v320_v59  ;;  %v909_v14 = vmul.f32 %v2537_v16, %v836_v60  ;;  %v1416_v19 = vadd.f32 %v1344_v55, %v1197_v3  ;;  %v472_v22 = vmul.f32 %v2527_v7, %v399_v1  ;;  %v839_v51 = vld [vmem:[%s2520_s9 + $0x162] sm:$0xff]  ;;  %v1276_v55 = vld [vmem:[%s2520_s9 + $0x154] sm:$0xff]  ;;  %v840_v1 = vld [vmem:[%s2520_s9 + $0x16a] sm:$0xff] }
  0x99   : >> { %v1198_v20 = vadd.f32 %v1126_v57, %v979_v4  ;;  %v691_v23 = vmul.f32 %v2531_v11, %v618_v2  ;;  %v980_v26 = vadd.f32 %v908_v63, %v761_v10  ;;  %v1346_v27 = vmul.f32 %v2549_v29, %v1273_v6  ;;  %v402_v52 = vld [vmem:[%s2520_s9 + $0x168] sm:$0xff]  ;;  %v324_v0 = vld [vmem:[#allocation2 + $0x78] sm:$0xff]  ;;  %v403_v6 = vld [vmem:[%s2520_s9 + $0x170] sm:$0xff] }
  0x9a   : >> { %v762_v28 = vadd.f32 %v690_v8, %v543_v13  ;;  %v1128_v30 = vmul.f32 %v2544_v24, %v1055_v9  ;;  %1488 = vst [vmem:[#allocation2 + $0x38] sm:$0xff] %v1416_v19  ;;  %v544_v35 = vadd.f32 %v472_v22, %v321_v15  ;;  %v910_v36 = vmul.f32 %v2537_v16, %v837_v17  ;;  %v1058_v63 = vld [vmem:[%s2520_s9 + $0x163] sm:$0xff]  ;;  %v622_v8 = vld [vmem:[%s2520_s9 + $0x171] sm:$0xff] }
  0x9b   : >> { %v1417_v34 = vadd.f32 %v1345_v5, %v1198_v20  ;;  %v473_v37 = vmul.f32 %v2527_v7, %v400_v18  ;;  %v1199_v40 = vadd.f32 %v1127_v12, %v980_v26  ;;  %v1347_v42 = vmul.f32 %v2549_v29, %v1274_v21  ;;  %v1277_v13 = vld [vmem:[%s2520_s9 + $0x164] sm:$0xff]  ;;  %v325_v21 = vld [vmem:[#allocation2 + $0x170] sm:$0xff] }
  0x9c   : >> { %v981_v41 = vadd.f32 %v909_v14, %v762_v28  ;;  %v692_v44 = vmul.f32 %v2531_v11, %v619_v25  ;;  %v763_v46 = vadd.f32 %v691_v23, %v544_v35  ;;  %v1129_v47 = vmul.f32 %v2544_v24, %v1056_v31  ;;  %v1059_v15 = vld [vmem:[%s2520_s9 + $0x16b] sm:$0xff]  ;;  %v404_v23 = vld [vmem:[%s2520_s9 + $0x180] sm:$0xff] }
  0x9d   : >> { %1489 = vst [vmem:[#allocation2 + $0x1a8] sm:$0xff] %v1417_v34  ;;  %v545_v48 = vadd.f32 %v473_v37, %v322_v32  ;;  %v911_v49 = vmul.f32 %v2537_v16, %v838_v33  ;;  %v1418_v53 = vadd.f32 %v1346_v27, %v1199_v40  ;;  %v474_v56 = vmul.f32 %v2527_v7, %v401_v38  ;;  %v841_v22 = vld [vmem:[%s2520_s9 + $0x172] sm:$0xff]  ;;  %v623_v31 = vld [vmem:[%s2520_s9 + $0x181] sm:$0xff] }
  0x9e   : >> { %v1200_v54 = vadd.f32 %v1128_v30, %v981_v41  ;;  %v693_v57 = vmul.f32 %v2531_v11, %v620_v39  ;;  %v982_v59 = vadd.f32 %v910_v36, %v763_v46  ;;  %v1348_v60 = vmul.f32 %v2549_v29, %v1275_v43  ;;  %v1278_v27 = vld [vmem:[%s2520_s9 + $0x16c] sm:$0xff]  ;;  %v326_v37 = vld [vmem:[#allocation2 + $0x198] sm:$0xff]  ;;  %v842_v38 = vld [vmem:[%s2520_s9 + $0x182] sm:$0xff] }
  0x9f   : >> { %v764_v61 = vadd.f32 %v692_v44, %v545_v48  ;;  %v1130_v62 = vmul.f32 %v2544_v24, %v1057_v45  ;;  %1490 = vst [vmem:[#allocation2 + $0x220] sm:$0xff] %v1418_v53  ;;  %v546_v3 = vadd.f32 %v474_v56, %v323_v50  ;;  %v912_v4 = vmul.f32 %v2537_v16, %v839_v51  ;;  %v1060_v36 = vld [vmem:[%s2520_s9 + $0x173] sm:$0xff]  ;;  %v405_v43 = vld [vmem:[%s2520_s9 + $0x188] sm:$0xff] }
  0xa0   : >> { %v1419_v2 = vadd.f32 %v1347_v42, %v1200_v54  ;;  %v475_v5 = vmul.f32 %v2527_v7, %v402_v52  ;;  %v1201_v9 = vadd.f32 %v1129_v47, %v982_v59  ;;  %v1349_v12 = vmul.f32 %v2549_v29, %v1276_v55  ;;  %v624_v44 = vld [vmem:[%s2520_s9 + $0x189] sm:$0xff]  ;;  %v1279_v48 = vld [vmem:[%s2520_s9 + $0x174] sm:$0xff]  ;;  %v327_v55 = vld [vmem:[#allocation2 + $0xe0] sm:$0xff] }
  0xa1   : >> { %v983_v10 = vadd.f32 %v911_v49, %v764_v61  ;;  %v694_v14 = vmul.f32 %v2531_v11, %v621_v58  ;;  %v765_v17 = vadd.f32 %v693_v57, %v546_v3  ;;  %v1131_v18 = vmul.f32 %v2544_v24, %v1058_v63  ;;  %v1061_v50 = vld [vmem:[%s2520_s9 + $0x183] sm:$0xff]  ;;  %v406_v57 = vld [vmem:[%s2520_s9 + $0x190] sm:$0xff] }
  0xa2   : >> { %1491 = vst [vmem:[#allocation2 + $0x1e8] sm:$0xff] %v1419_v2  ;;  %v547_v19 = vadd.f32 %v475_v5, %v324_v0  ;;  %v913_v20 = vmul.f32 %v2537_v16, %v840_v1  ;;  %v1420_v25 = vadd.f32 %v1348_v60, %v1201_v9  ;;  %v476_v28 = vmul.f32 %v2527_v7, %v403_v6  ;;  %v843_v56 = vld [vmem:[%s2520_s9 + $0x18a] sm:$0xff]  ;;  %v328_v5 = vld [vmem:[#allocation2 + $0x1e0] sm:$0xff]  ;;  %v844_v6 = vld [vmem:[%s2520_s9 + $0x192] sm:$0xff] }
  0xa3   : >> { %v1202_v26 = vadd.f32 %v1130_v62, %v983_v10  ;;  %v695_v30 = vmul.f32 %v2531_v11, %v622_v8  ;;  %v984_v32 = vadd.f32 %v912_v4, %v765_v17  ;;  %v1350_v33 = vmul.f32 %v2549_v29, %v1277_v13  ;;  %v1280_v60 = vld [vmem:[%s2520_s9 + $0x184] sm:$0xff]  ;;  %v625_v63 = vld [vmem:[%s2520_s9 + $0x191] sm:$0xff] }
  0xa4   : >> { %v766_v34 = vadd.f32 %v694_v14, %v547_v19  ;;  %v1132_v35 = vmul.f32 %v2544_v24, %v1059_v15  ;;  %1492 = vst [vmem:[#allocation2 + $0x1c8] sm:$0xff] %v1420_v25  ;;  %v548_v40 = vadd.f32 %v476_v28, %v325_v21  ;;  %v914_v41 = vmul.f32 %v2537_v16, %v841_v22  ;;  %v1062_v4 = vld [vmem:[%s2520_s9 + $0x18b] sm:$0xff]  ;;  %v407_v13 = vld [vmem:[%s2520_s9 + $0x1a0] sm:$0xff]  ;;  %v1063_v21 = vld [vmem:[%s2520_s9 + $0x193] sm:$0xff] }
  0xa5   : >> { %v1421_v39 = vadd.f32 %v1349_v12, %v1202_v26  ;;  %v477_v42 = vmul.f32 %v2527_v7, %v404_v23  ;;  %v1203_v45 = vadd.f32 %v1131_v18, %v984_v32  ;;  %v1351_v47 = vmul.f32 %v2549_v29, %v1278_v27  ;;  %v626_v14 = vld [vmem:[%s2520_s9 + $0x1a1] sm:$0xff]  ;;  %v1281_v19 = vld [vmem:[%s2520_s9 + $0x18c] sm:$0xff] }
  0xa6   : >> { %v985_v46 = vadd.f32 %v913_v20, %v766_v34  ;;  %v696_v49 = vmul.f32 %v2531_v11, %v623_v31  ;;  %v767_v51 = vadd.f32 %v695_v30, %v548_v40  ;;  %v1133_v52 = vmul.f32 %v2544_v24, %v1060_v36  ;;  %v329_v27 = vld [vmem:[#allocation2 + $0x1f0] sm:$0xff]  ;;  %v845_v28 = vld [vmem:[%s2520_s9 + $0x1a2] sm:$0xff] }
  0xa7   : >> { %1493 = vst [vmem:[#allocation2 + $0x80] sm:$0xff] %v1421_v39  ;;  %v549_v53 = vadd.f32 %v477_v42, %v326_v37  ;;  %v915_v54 = vmul.f32 %v2537_v16, %v842_v38  ;;  %v1422_v58 = vadd.f32 %v1350_v33, %v1203_v45  ;;  %v478_v61 = vmul.f32 %v2527_v7, %v405_v43  ;;  %v408_v30 = vld [vmem:[%s2520_s9 + $0x1a8] sm:$0xff]  ;;  %v1282_v33 = vld [vmem:[%s2520_s9 + $0x194] sm:$0xff] }
  0xa8   : >> { %v1204_v59 = vadd.f32 %v1132_v35, %v985_v46  ;;  %v697_v62 = vmul.f32 %v2531_v11, %v624_v44  ;;  %v986_v0 = vadd.f32 %v914_v41, %v767_v51  ;;  %v1352_v1 = vmul.f32 %v2549_v29, %v1279_v48  ;;  %v627_v36 = vld [vmem:[%s2520_s9 + $0x1a9] sm:$0xff] }
  0xa9   : >> { %v768_v2 = vadd.f32 %v696_v49, %v549_v53  ;;  %v1134_v3 = vmul.f32 %v2544_v24, %v1061_v50  ;;  %1494 = vst [vmem:[#allocation2 + $0xf8] sm:$0xff] %v1422_v58  ;;  %v550_v9 = vadd.f32 %v478_v61, %v327_v55  ;;  %v916_v10 = vmul.f32 %v2537_v16, %v843_v56  ;;  %v1064_v41 = vld [vmem:[%s2520_s9 + $0x1a3] sm:$0xff]  ;;  %v409_v48 = vld [vmem:[%s2520_s9 + $0x1b0] sm:$0xff] }
  0xaa   : >> { %v1423_v8 = vadd.f32 %v1351_v47, %v1204_v59  ;;  %v479_v12 = vmul.f32 %v2527_v7, %v406_v57  ;;  %v1205_v15 = vadd.f32 %v1133_v52, %v986_v0  ;;  %v1353_v18 = vmul.f32 %v2549_v29, %v1280_v60  ;;  %v330_v42 = vld [vmem:[#allocation2 + $0x48] sm:$0xff]  ;;  %v628_v49 = vld [vmem:[%s2520_s9 + $0x1b1] sm:$0xff] }
  0xab   : >> { %v987_v17 = vadd.f32 %v915_v54, %v768_v2  ;;  %v698_v20 = vmul.f32 %v2531_v11, %v625_v63  ;;  %v769_v22 = vadd.f32 %v697_v62, %v550_v9  ;;  %v1135_v23 = vmul.f32 %v2544_v24, %v1062_v4  ;;  %v846_v43 = vld [vmem:[%s2520_s9 + $0x1aa] sm:$0xff]  ;;  %v331_v60 = vld [vmem:[#allocation2 + $0x98] sm:$0xff]  ;;  %v410_v62 = vld [vmem:[%s2520_s9 + $0x1c0] sm:$0xff] }
  0xac   : >> { %1495 = vst [vmem:[#allocation2 + $0x78] sm:$0xff] %v1423_v8  ;;  %v551_v25 = vadd.f32 %v479_v12, %v328_v5  ;;  %v917_v26 = vmul.f32 %v2537_v16, %v844_v6  ;;  %v1424_v31 = vadd.f32 %v1352_v1, %v1205_v15  ;;  %v480_v34 = vmul.f32 %v2527_v7, %v407_v13  ;;  %v1283_v53 = vld [vmem:[%s2520_s9 + $0x1a4] sm:$0xff]  ;;  %v847_v61 = vld [vmem:[%s2520_s9 + $0x1b2] sm:$0xff] }
  0xad   : >> { %v1206_v32 = vadd.f32 %v1134_v3, %v987_v17  ;;  %v699_v35 = vmul.f32 %v2531_v11, %v626_v14  ;;  %v988_v37 = vadd.f32 %v916_v10, %v769_v22  ;;  %v1354_v38 = vmul.f32 %v2549_v29, %v1281_v19  ;;  %v1065_v55 = vld [vmem:[%s2520_s9 + $0x1ab] sm:$0xff]  ;;  %v629_v4 = vld [vmem:[%s2520_s9 + $0x1c1] sm:$0xff]  ;;  %v1066_v10 = vld [vmem:[%s2520_s9 + $0x1b3] sm:$0xff] }
  0xae   : >> { %v770_v39 = vadd.f32 %v698_v20, %v551_v25  ;;  %v1136_v40 = vmul.f32 %v2544_v24, %v1063_v21  ;;  %1496 = vst [vmem:[#allocation2 + $0x170] sm:$0xff] %v1424_v31  ;;  %v552_v45 = vadd.f32 %v480_v34, %v329_v27  ;;  %v918_v46 = vmul.f32 %v2537_v16, %v845_v28  ;;  %v1284_v1 = vld [vmem:[%s2520_s9 + $0x1ac] sm:$0xff]  ;;  %v332_v12 = vld [vmem:[#allocation2 + $0x238] sm:$0xff]  ;;  %v848_v13 = vld [vmem:[%s2520_s9 + $0x1c2] sm:$0xff] }
  0xaf   : >> { %v1425_v44 = vadd.f32 %v1353_v18, %v1206_v32  ;;  %v481_v47 = vmul.f32 %v2527_v7, %v408_v30  ;;  %v1207_v50 = vadd.f32 %v1135_v23, %v988_v37  ;;  %v1355_v52 = vmul.f32 %v2549_v29, %v1282_v33  ;;  %v411_v19 = vld [vmem:[%s2520_s9 + $0x1c8] sm:$0xff]  ;;  %v1285_v25 = vld [vmem:[%s2520_s9 + $0x1b4] sm:$0xff]  ;;  %v333_v33 = vld [vmem:[#allocation2 + $0x160] sm:$0xff] }
  0xb0   : >> { %v989_v51 = vadd.f32 %v917_v26, %v770_v39  ;;  %v700_v54 = vmul.f32 %v2531_v11, %v627_v36  ;;  %v771_v56 = vadd.f32 %v699_v35, %v552_v45  ;;  %v1137_v57 = vmul.f32 %v2544_v24, %v1064_v41  ;;  %v630_v20 = vld [vmem:[%s2520_s9 + $0x1c9] sm:$0xff]  ;;  %v631_v41 = vld [vmem:[%s2520_s9 + $0x1d1] sm:$0xff] }
  0xb1   : >> { %1497 = vst [vmem:[#allocation2 + $0x198] sm:$0xff] %v1425_v44  ;;  %v553_v58 = vadd.f32 %v481_v47, %v330_v42  ;;  %v919_v59 = vmul.f32 %v2537_v16, %v846_v43  ;;  %v1426_v63 = vadd.f32 %v1354_v38, %v1207_v50  ;;  %v482_v2 = vmul.f32 %v2527_v7, %v409_v48  ;;  %v1067_v27 = vld [vmem:[%s2520_s9 + $0x1c3] sm:$0xff]  ;;  %v412_v35 = vld [vmem:[%s2520_s9 + $0x1d0] sm:$0xff] }
  0xb2   : >> { %v1208_v0 = vadd.f32 %v1136_v40, %v989_v51  ;;  %v701_v3 = vmul.f32 %v2531_v11, %v628_v49  ;;  %v990_v5 = vadd.f32 %v918_v46, %v771_v56  ;;  %v1356_v6 = vmul.f32 %v2549_v29, %v1283_v53  ;;  %v849_v34 = vld [vmem:[%s2520_s9 + $0x1ca] sm:$0xff]  ;;  %v850_v48 = vld [vmem:[%s2520_s9 + $0x1d2] sm:$0xff]  ;;  %v413_v53 = vld [vmem:[%s2520_s9 + $0x1e0] sm:$0xff] }
  0xb3   : >> { %v772_v8 = vadd.f32 %v700_v54, %v553_v58  ;;  %v1138_v9 = vmul.f32 %v2544_v24, %v1065_v55  ;;  %1498 = vst [vmem:[#allocation2 + $0xe0] sm:$0xff] %v1426_v63  ;;  %v554_v15 = vadd.f32 %v482_v2, %v331_v60  ;;  %v920_v17 = vmul.f32 %v2537_v16, %v847_v61  ;;  %v1286_v38 = vld [vmem:[%s2520_s9 + $0x1c4] sm:$0xff]  ;;  %v334_v47 = vld [vmem:[#allocation2 + $0x50] sm:$0xff] }
  0xb4   : >> { %v1427_v14 = vadd.f32 %v1355_v52, %v1208_v0  ;;  %v483_v18 = vmul.f32 %v2527_v7, %v410_v62  ;;  %v1209_v21 = vadd.f32 %v1137_v57, %v990_v5  ;;  %v1357_v23 = vmul.f32 %v2549_v29, %v1284_v1  ;;  %v1068_v46 = vld [vmem:[%s2520_s9 + $0x1cb] sm:$0xff]  ;;  %v632_v54 = vld [vmem:[%s2520_s9 + $0x1e1] sm:$0xff]  ;;  %v1069_v60 = vld [vmem:[%s2520_s9 + $0x1d3] sm:$0xff] }
  0xb5   : >> { %v991_v22 = vadd.f32 %v919_v59, %v772_v8  ;;  %v702_v26 = vmul.f32 %v2531_v11, %v629_v4  ;;  %v773_v28 = vadd.f32 %v701_v3, %v554_v15  ;;  %v1139_v30 = vmul.f32 %v2544_v24, %v1066_v10  ;;  %v1287_v58 = vld [vmem:[%s2520_s9 + $0x1cc] sm:$0xff]  ;;  %v335_v1 = vld [vmem:[#allocation2 + $0x100] sm:$0xff] }
  0xb6   : >> { %1499 = vst [vmem:[#allocation2 + $0x1e0] sm:$0xff] %v1427_v14  ;;  %v555_v31 = vadd.f32 %v483_v18, %v332_v12  ;;  %v921_v32 = vmul.f32 %v2537_v16, %v848_v13  ;;  %v1428_v36 = vadd.f32 %v1356_v6, %v1209_v21  ;;  %v484_v39 = vmul.f32 %v2527_v7, %v411_v19  ;;  %v851_v2 = vld [vmem:[%s2520_s9 + $0x1e2] sm:$0xff]  ;;  %v1288_v6 = vld [vmem:[%s2520_s9 + $0x1d4] sm:$0xff]  ;;  %v852_v19 = vld [vmem:[%s2520_s9 + $0x1ea] sm:$0xff] }
  0xb7   : >> { %v1210_v37 = vadd.f32 %v1138_v9, %v991_v22  ;;  %v703_v40 = vmul.f32 %v2531_v11, %v630_v20  ;;  %v992_v42 = vadd.f32 %v920_v17, %v773_v28  ;;  %v1358_v43 = vmul.f32 %v2549_v29, %v1285_v25  ;;  %v414_v3 = vld [vmem:[%s2520_s9 + $0x1e8] sm:$0xff]  ;;  %v336_v18 = vld [vmem:[#allocation2 + $0x30] sm:$0xff] }
  0xb8   : >> { %v774_v44 = vadd.f32 %v702_v26, %v555_v31  ;;  %v1140_v45 = vmul.f32 %v2544_v24, %v1067_v27  ;;  %1500 = vst [vmem:[#allocation2 + $0x1f0] sm:$0xff] %v1428_v36  ;;  %v556_v50 = vadd.f32 %v484_v39, %v333_v33  ;;  %v922_v51 = vmul.f32 %v2537_v16, %v849_v34  ;;  %v633_v10 = vld [vmem:[%s2520_s9 + $0x1e9] sm:$0xff]  ;;  %v634_v26 = vld [vmem:[%s2520_s9 + $0x1f1] sm:$0xff] }
  0xb9   : >> { %v1429_v49 = vadd.f32 %v1357_v23, %v1210_v37  ;;  %v485_v52 = vmul.f32 %v2527_v7, %v412_v35  ;;  %v1211_v55 = vadd.f32 %v1139_v30, %v992_v42  ;;  %v1359_v57 = vmul.f32 %v2549_v29, %v1286_v38  ;;  %v1070_v17 = vld [vmem:[%s2520_s9 + $0x1e3] sm:$0xff]  ;;  %v415_v25 = vld [vmem:[%s2520_s9 + $0x1f0] sm:$0xff] }
  0xba   : >> { %v993_v56 = vadd.f32 %v921_v32, %v774_v44  ;;  %v704_v59 = vmul.f32 %v2531_v11, %v631_v41  ;;  %v775_v61 = vadd.f32 %v703_v40, %v556_v50  ;;  %v1141_v62 = vmul.f32 %v2544_v24, %v1068_v46  ;;  %v1289_v31 = vld [vmem:[%s2520_s9 + $0x1e4] sm:$0xff]  ;;  %v337_v38 = vld [vmem:[#allocation2 + $0x1b0] sm:$0xff] }
  0xbb   : >> { %1501 = vst [vmem:[#allocation2 + $0x48] sm:$0xff] %v1429_v49  ;;  %v557_v63 = vadd.f32 %v485_v52, %v334_v47  ;;  %v923_v0 = vmul.f32 %v2537_v16, %v850_v48  ;;  %v1430_v4 = vadd.f32 %v1358_v43, %v1211_v55  ;;  %v486_v8 = vmul.f32 %v2527_v7, %v413_v53  ;;  %v1071_v33 = vld [vmem:[%s2520_s9 + $0x1eb] sm:$0xff]  ;;  %v416_v40 = vld [vmem:[%s2520_s9 + $0x200] sm:$0xff] }
  0xbc   : >> { %v1212_v5 = vadd.f32 %v1140_v45, %v993_v56  ;;  %v705_v9 = vmul.f32 %v2531_v11, %v632_v54  ;;  %v994_v12 = vadd.f32 %v922_v51, %v775_v61  ;;  %v1360_v13 = vmul.f32 %v2549_v29, %v1287_v58  ;;  %v853_v39 = vld [vmem:[%s2520_s9 + $0x1f2] sm:$0xff]  ;;  %v635_v46 = vld [vmem:[%s2520_s9 + $0x201] sm:$0xff] }
  0xbd   : >> { %v776_v14 = vadd.f32 %v704_v59, %v557_v63  ;;  %v1142_v15 = vmul.f32 %v2544_v24, %v1069_v60  ;;  %1502 = vst [vmem:[#allocation2 + $0x98] sm:$0xff] %v1430_v4  ;;  %v558_v21 = vadd.f32 %v486_v8, %v335_v1  ;;  %v924_v22 = vmul.f32 %v2537_v16, %v851_v2  ;;  %v1290_v43 = vld [vmem:[%s2520_s9 + $0x1ec] sm:$0xff]  ;;  %v854_v53 = vld [vmem:[%s2520_s9 + $0x202] sm:$0xff]  ;;  %v1291_v63 = vld [vmem:[%s2520_s9 + $0x1f4] sm:$0xff] }
  0xbe   : >> { %v1431_v20 = vadd.f32 %v1359_v57, %v1212_v5  ;;  %v487_v23 = vmul.f32 %v2527_v7, %v414_v3  ;;  %v1213_v27 = vadd.f32 %v1141_v62, %v994_v12  ;;  %v1361_v30 = vmul.f32 %v2549_v29, %v1288_v6  ;;  %v1072_v51 = vld [vmem:[%s2520_s9 + $0x1f3] sm:$0xff]  ;;  %v417_v58 = vld [vmem:[%s2520_s9 + $0x208] sm:$0xff] }
  0xbf   : >> { %v995_v28 = vadd.f32 %v923_v0, %v776_v14  ;;  %v706_v32 = vmul.f32 %v2531_v11, %v633_v10  ;;  %v777_v34 = vadd.f32 %v705_v9, %v558_v21  ;;  %v1143_v35 = vmul.f32 %v2544_v24, %v1070_v17  ;;  %v338_v52 = vld [vmem:[#allocation2 + $0x90] sm:$0xff]  ;;  %v1073_v1 = vld [vmem:[%s2520_s9 + $0x203] sm:$0xff] }
  0xc0   : >> { %1503 = vst [vmem:[#allocation2 + $0x238] sm:$0xff] %v1431_v20  ;;  %v559_v36 = vadd.f32 %v487_v23, %v336_v18  ;;  %v925_v37 = vmul.f32 %v2537_v16, %v852_v19  ;;  %v1432_v41 = vadd.f32 %v1360_v13, %v1213_v27  ;;  %v488_v44 = vmul.f32 %v2527_v7, %v415_v25  ;;  %v636_v59 = vld [vmem:[%s2520_s9 + $0x209] sm:$0xff]  ;;  %v637_v17 = vld [vmem:[%s2520_s9 + $0x211] sm:$0xff] }
  0xc1   : >> { %v1214_v42 = vadd.f32 %v1142_v15, %v995_v28  ;;  %v707_v45 = vmul.f32 %v2531_v11, %v634_v26  ;;  %v996_v47 = vadd.f32 %v924_v22, %v777_v34  ;;  %v1362_v48 = vmul.f32 %v2549_v29, %v1289_v31  ;;  %v339_v6 = vld [vmem:[#allocation2 + $0x130] sm:$0xff]  ;;  %v1292_v13 = vld [vmem:[%s2520_s9 + $0x204] sm:$0xff] }
  0xc2   : >> { %v778_v49 = vadd.f32 %v706_v32, %v559_v36  ;;  %v1144_v50 = vmul.f32 %v2544_v24, %v1071_v33  ;;  %1504 = vst [vmem:[#allocation2 + $0x160] sm:$0xff] %v1432_v41  ;;  %v560_v55 = vadd.f32 %v488_v44, %v337_v38  ;;  %v926_v56 = vmul.f32 %v2537_v16, %v853_v39  ;;  %v855_v8 = vld [vmem:[%s2520_s9 + $0x20a] sm:$0xff]  ;;  %v856_v25 = vld [vmem:[%s2520_s9 + $0x212] sm:$0xff]  ;;  %v419_v31 = vld [vmem:[%s2520_s9 + $0x220] sm:$0xff] }
  0xc3   : >> { %v1433_v54 = vadd.f32 %v1361_v30, %v1214_v42  ;;  %v489_v57 = vmul.f32 %v2527_v7, %v416_v40  ;;  %v1215_v60 = vadd.f32 %v1143_v35, %v996_v47  ;;  %v1363_v62 = vmul.f32 %v2549_v29, %v1290_v43  ;;  %v418_v9 = vld [vmem:[%s2520_s9 + $0x210] sm:$0xff]  ;;  %v340_v23 = vld [vmem:[#allocation2 + $0x68] sm:$0xff] }
  0xc4   : >> { %v997_v61 = vadd.f32 %v925_v37, %v778_v49  ;;  %v708_v0 = vmul.f32 %v2531_v11, %v635_v46  ;;  %v779_v2 = vadd.f32 %v707_v45, %v560_v55  ;;  %v1145_v3 = vmul.f32 %v2544_v24, %v1072_v51  ;;  %v1074_v22 = vld [vmem:[%s2520_s9 + $0x20b] sm:$0xff]  ;;  %v638_v32 = vld [vmem:[%s2520_s9 + $0x221] sm:$0xff]  ;;  %v1075_v38 = vld [vmem:[%s2520_s9 + $0x213] sm:$0xff] }
  0xc5   : >> { %1505 = vst [vmem:[#allocation2 + $0x50] sm:$0xff] %v1433_v54  ;;  %v561_v4 = vadd.f32 %v489_v57, %v338_v52  ;;  %v927_v5 = vmul.f32 %v2537_v16, %v854_v53  ;;  %v1434_v10 = vadd.f32 %v1362_v48, %v1215_v60  ;;  %v490_v14 = vmul.f32 %v2527_v7, %v417_v58  ;;  %v1293_v36 = vld [vmem:[%s2520_s9 + $0x20c] sm:$0xff]  ;;  %v857_v44 = vld [vmem:[%s2520_s9 + $0x222] sm:$0xff]  ;;  %v1294_v48 = vld [vmem:[%s2520_s9 + $0x214] sm:$0xff] }
  0xc6   : >> { %v1216_v12 = vadd.f32 %v1144_v50, %v997_v61  ;;  %v709_v15 = vmul.f32 %v2531_v11, %v636_v59  ;;  %v998_v18 = vadd.f32 %v926_v56, %v779_v2  ;;  %v1364_v19 = vmul.f32 %v2549_v29, %v1291_v63  ;;  %v341_v43 = vld [vmem:[#allocation2 + $0x230] sm:$0xff]  ;;  %v420_v45 = vld [vmem:[%s2520_s9 + $0x228] sm:$0xff]  ;;  %v342_v57 = vld [vmem:[#allocation2 + $0x1d8] sm:$0xff] }
  0xc7   : >> { %v780_v20 = vadd.f32 %v708_v0, %v561_v4  ;;  %v1146_v21 = vmul.f32 %v2544_v24, %v1073_v1  ;;  %1506 = vst [vmem:[#allocation2 + $0x100] sm:$0xff] %v1434_v10  ;;  %v562_v27 = vadd.f32 %v490_v14, %v339_v6  ;;  %v928_v28 = vmul.f32 %v2537_v16, %v855_v8  ;;  %v639_v51 = vld [vmem:[%s2520_s9 + $0x229] sm:$0xff]  ;;  %v640_v0 = vld [vmem:[%s2520_s9 + $0x231] sm:$0xff] }
  0xc8   : >> { %v1435_v26 = vadd.f32 %v1363_v62, %v1216_v12  ;;  %v491_v30 = vmul.f32 %v2527_v7, %v418_v9  ;;  %v1217_v33 = vadd.f32 %v1145_v3, %v998_v18  ;;  %v1365_v35 = vmul.f32 %v2549_v29, %v1292_v13  ;;  %v1076_v56 = vld [vmem:[%s2520_s9 + $0x223] sm:$0xff]  ;;  %v421_v63 = vld [vmem:[%s2520_s9 + $0x230] sm:$0xff] }
  0xc9   : >> { %v999_v34 = vadd.f32 %v927_v5, %v780_v20  ;;  %v710_v37 = vmul.f32 %v2531_v11, %v637_v17  ;;  %v781_v39 = vadd.f32 %v709_v15, %v562_v27  ;;  %v1147_v40 = vmul.f32 %v2544_v24, %v1074_v22  ;;  %v858_v58 = vld [vmem:[%s2520_s9 + $0x22a] sm:$0xff]  ;;  %v859_v14 = vld [vmem:[%s2520_s9 + $0x232] sm:$0xff]  ;;  %v422_v15 = vld [vmem:[%s2520_s9 + $0x240] sm:$0xff] }
  0xca   : >> { %1507 = vst [vmem:[#allocation2 + $0x30] sm:$0xff] %v1435_v26  ;;  %v563_v41 = vadd.f32 %v491_v30, %v340_v23  ;;  %v929_v42 = vmul.f32 %v2537_v16, %v856_v25  ;;  %v1436_v46 = vadd.f32 %v1364_v19, %v1217_v33  ;;  %v492_v49 = vmul.f32 %v2527_v7, %v419_v31  ;;  %v1295_v4 = vld [vmem:[%s2520_s9 + $0x224] sm:$0xff]  ;;  %v1296_v19 = vld [vmem:[%s2520_s9 + $0x22c] sm:$0xff]  ;;  %v344_v30 = vld [vmem:[#allocation2 + $0x218] sm:$0xff] }
  0xcb   : >> { %v1218_v47 = vadd.f32 %v1146_v21, %v999_v34  ;;  %v711_v50 = vmul.f32 %v2531_v11, %v638_v32  ;;  %v1000_v52 = vadd.f32 %v928_v28, %v781_v39  ;;  %v1366_v53 = vmul.f32 %v2549_v29, %v1293_v36  ;;  %v1077_v6 = vld [vmem:[%s2520_s9 + $0x22b] sm:$0xff]  ;;  %v641_v22 = vld [vmem:[%s2520_s9 + $0x241] sm:$0xff]  ;;  %v1078_v28 = vld [vmem:[%s2520_s9 + $0x233] sm:$0xff] }
  0xcc   : >> { %v782_v54 = vadd.f32 %v710_v37, %v563_v41  ;;  %v1148_v55 = vmul.f32 %v2544_v24, %v1075_v38  ;;  %1508 = vst [vmem:[#allocation2 + $0x1b0] sm:$0xff] %v1436_v46  ;;  %v564_v60 = vadd.f32 %v492_v49, %v341_v43  ;;  %v930_v61 = vmul.f32 %v2537_v16, %v857_v44  ;;  %v343_v13 = vld [vmem:[#allocation2 + $0x228] sm:$0xff]  ;;  %v1297_v41 = vld [vmem:[%s2520_s9 + $0x234] sm:$0xff] }
  0xcd   : >> { %v1437_v59 = vadd.f32 %v1365_v35, %v1218_v47  ;;  %v493_v62 = vmul.f32 %v2527_v7, %v420_v45  ;;  %v1219_v1 = vadd.f32 %v1147_v40, %v1000_v52  ;;  %v1367_v3 = vmul.f32 %v2549_v29, %v1294_v48  ;;  %v860_v31 = vld [vmem:[%s2520_s9 + $0x242] sm:$0xff]  ;;  %v861_v49 = vld [vmem:[%s2520_s9 + $0x24a] sm:$0xff] }
  0xce   : >> { %v1001_v2 = vadd.f32 %v929_v42, %v782_v54  ;;  %v712_v5 = vmul.f32 %v2531_v11, %v639_v51  ;;  %v783_v8 = vadd.f32 %v711_v50, %v564_v60  ;;  %v1149_v9 = vmul.f32 %v2544_v24, %v1076_v56  ;;  %v423_v36 = vld [vmem:[%s2520_s9 + $0x248] sm:$0xff]  ;;  %v345_v48 = vld [vmem:[#allocation2 + $0x200] sm:$0xff]  ;;  %v424_v50 = vld [vmem:[%s2520_s9 + $0x250] sm:$0xff] }
  0xcf   : >> { %1509 = vst [vmem:[#allocation2 + $0x90] sm:$0xff] %v1437_v59  ;;  %v565_v10 = vadd.f32 %v493_v62, %v342_v57  ;;  %v931_v12 = vmul.f32 %v2537_v16, %v858_v58  ;;  %v1438_v17 = vadd.f32 %v1366_v53, %v1219_v1  ;;  %v494_v20 = vmul.f32 %v2527_v7, %v421_v63  ;;  %v642_v37 = vld [vmem:[%s2520_s9 + $0x249] sm:$0xff]  ;;  %v643_v56 = vld [vmem:[%s2520_s9 + $0x251] sm:$0xff] }
  0xd0   : >> { %v1220_v18 = vadd.f32 %v1148_v55, %v1001_v2  ;;  %v713_v21 = vmul.f32 %v2531_v11, %v640_v0  ;;  %v1002_v23 = vadd.f32 %v930_v61, %v783_v8  ;;  %v1368_v25 = vmul.f32 %v2549_v29, %v1295_v4  ;;  %v1079_v43 = vld [vmem:[%s2520_s9 + $0x243] sm:$0xff]  ;;  %v1080_v61 = vld [vmem:[%s2520_s9 + $0x24b] sm:$0xff] }
  0xd1   : >> { %v784_v26 = vadd.f32 %v712_v5, %v565_v10  ;;  %v1150_v27 = vmul.f32 %v2544_v24, %v1077_v6  ;;  %1510 = vst [vmem:[#allocation2 + $0x130] sm:$0xff] %v1438_v17  ;;  %v566_v33 = vadd.f32 %v494_v20, %v343_v13  ;;  %v932_v34 = vmul.f32 %v2537_v16, %v859_v14  ;;  %v1298_v53 = vld [vmem:[%s2520_s9 + $0x244] sm:$0xff]  ;;  %v346_v62 = vld [vmem:[#allocation2 + $0x10] sm:$0xff] }
  0xd2   : >> { %v1439_v32 = vadd.f32 %v1367_v3, %v1220_v18  ;;  %v495_v35 = vmul.f32 %v2527_v7, %v422_v15  ;;  %v1221_v38 = vadd.f32 %v1149_v9, %v1002_v23  ;;  %v1369_v40 = vmul.f32 %v2549_v29, %v1296_v19  ;;  %v862_v63 = vld [vmem:[%s2520_s9 + $0x252] sm:$0xff]  ;;  %v425_v4 = vld [vmem:[%s2520_s9 + $0x260] sm:$0xff]  ;;  %v347_v19 = vld [vmem:[#allocation2 + $0x128] sm:$0xff] }
  0xd3   : >> { %v1003_v39 = vadd.f32 %v931_v12, %v784_v26  ;;  %v714_v42 = vmul.f32 %v2531_v11, %v641_v22  ;;  %v785_v44 = vadd.f32 %v713_v21, %v566_v33  ;;  %v1151_v45 = vmul.f32 %v2544_v24, %v1078_v28  ;;  %v644_v5 = vld [vmem:[%s2520_s9 + $0x261] sm:$0xff]  ;;  %v1299_v10 = vld [vmem:[%s2520_s9 + $0x24c] sm:$0xff] }
  0xd4   : >> { %1511 = vst [vmem:[#allocation2 + $0x68] sm:$0xff] %v1439_v32  ;;  %v567_v46 = vadd.f32 %v495_v35, %v344_v30  ;;  %v933_v47 = vmul.f32 %v2537_v16, %v860_v31  ;;  %v1440_v51 = vadd.f32 %v1368_v25, %v1221_v38  ;;  %v496_v54 = vmul.f32 %v2527_v7, %v423_v36  ;;  %v1081_v13 = vld [vmem:[%s2520_s9 + $0x253] sm:$0xff]  ;;  %v863_v20 = vld [vmem:[%s2520_s9 + $0x262] sm:$0xff]  ;;  %v864_v36 = vld [vmem:[%s2520_s9 + $0x26a] sm:$0xff] }
  0xd5   : >> { %v1222_v52 = vadd.f32 %v1150_v27, %v1003_v39  ;;  %v715_v55 = vmul.f32 %v2531_v11, %v642_v37  ;;  %v1004_v57 = vadd.f32 %v932_v34, %v785_v44  ;;  %v1370_v58 = vmul.f32 %v2549_v29, %v1297_v41  ;;  %v426_v21 = vld [vmem:[%s2520_s9 + $0x268] sm:$0xff]  ;;  %v1300_v25 = vld [vmem:[%s2520_s9 + $0x254] sm:$0xff] }
  0xd6   : >> { %v786_v59 = vadd.f32 %v714_v42, %v567_v46  ;;  %v1152_v60 = vmul.f32 %v2544_v24, %v1079_v43  ;;  %1512 = vst [vmem:[#allocation2 + $0x230] sm:$0xff] %v1440_v51  ;;  %v568_v1 = vadd.f32 %v496_v54, %v345_v48  ;;  %v934_v2 = vmul.f32 %v2537_v16, %v861_v49  ;;  %v645_v28 = vld [vmem:[%s2520_s9 + $0x269] sm:$0xff]  ;;  %v348_v35 = vld [vmem:[#allocation2 + $0x178] sm:$0xff] }
  0xd7   : >> { %v1441_v0 = vadd.f32 %v1369_v40, %v1222_v52  ;;  %v497_v3 = vmul.f32 %v2527_v7, %v424_v50  ;;  %v1223_v6 = vadd.f32 %v1151_v45, %v1004_v57  ;;  %v1371_v9 = vmul.f32 %v2549_v29, %v1298_v53  ;;  %v1082_v34 = vld [vmem:[%s2520_s9 + $0x263] sm:$0xff]  ;;  %v427_v41 = vld [vmem:[%s2520_s9 + $0x270] sm:$0xff] }
  0xd8   : >> { %v1005_v8 = vadd.f32 %v933_v47, %v786_v59  ;;  %v716_v12 = vmul.f32 %v2531_v11, %v643_v56  ;;  %v787_v14 = vadd.f32 %v715_v55, %v568_v1  ;;  %v1153_v15 = vmul.f32 %v2544_v24, %v1080_v61  ;;  %v646_v42 = vld [vmem:[%s2520_s9 + $0x271] sm:$0xff]  ;;  %v1301_v46 = vld [vmem:[%s2520_s9 + $0x264] sm:$0xff] }
  0xd9   : >> { %1513 = vst [vmem:[#allocation2 + $0x1d8] sm:$0xff] %v1441_v0  ;;  %v569_v17 = vadd.f32 %v497_v3, %v346_v62  ;;  %v935_v18 = vmul.f32 %v2537_v16, %v862_v63  ;;  %v1442_v22 = vadd.f32 %v1370_v58, %v1223_v6  ;;  %v498_v26 = vmul.f32 %v2527_v7, %v425_v4  ;;  %v1083_v48 = vld [vmem:[%s2520_s9 + $0x26b] sm:$0xff]  ;;  %v428_v55 = vld [vmem:[%s2520_s9 + $0x280] sm:$0xff] }
  0xda   : >> { %v1224_v23 = vadd.f32 %v1152_v60, %v1005_v8  ;;  %v717_v27 = vmul.f32 %v2531_v11, %v644_v5  ;;  %v1006_v30 = vadd.f32 %v934_v2, %v787_v14  ;;  %v1372_v31 = vmul.f32 %v2549_v29, %v1299_v10  ;;  %v349_v53 = vld [vmem:[#allocation2 + $0x208] sm:$0xff]  ;;  %v865_v54 = vld [vmem:[%s2520_s9 + $0x272] sm:$0xff] }
  0xdb   : >> { %v788_v32 = vadd.f32 %v716_v12, %v569_v17  ;;  %v1154_v33 = vmul.f32 %v2544_v24, %v1081_v13  ;;  %1514 = vst [vmem:[#allocation2 + $0x228] sm:$0xff] %v1442_v22  ;;  %v570_v38 = vadd.f32 %v498_v26, %v347_v19  ;;  %v936_v39 = vmul.f32 %v2537_v16, %v863_v20  ;;  %v1302_v58 = vld [vmem:[%s2520_s9 + $0x26c] sm:$0xff]  ;;  %v647_v61 = vld [vmem:[%s2520_s9 + $0x281] sm:$0xff]  ;;  %v1303_v17 = vld [vmem:[%s2520_s9 + $0x274] sm:$0xff] }
  0xdc   : >> { %v1443_v37 = vadd.f32 %v1371_v9, %v1224_v23  ;;  %v499_v40 = vmul.f32 %v2527_v7, %v426_v21  ;;  %v1225_v43 = vadd.f32 %v1153_v15, %v1006_v30  ;;  %v1373_v45 = vmul.f32 %v2549_v29, %v1300_v25  ;;  %v1084_v2 = vld [vmem:[%s2520_s9 + $0x273] sm:$0xff]  ;;  %v866_v4 = vld [vmem:[%s2520_s9 + $0x282] sm:$0xff]  ;;  %v867_v26 = vld [vmem:[%s2520_s9 + $0x28a] sm:$0xff] }
  0xdd   : >> { %v1007_v44 = vadd.f32 %v935_v18, %v788_v32  ;;  %v718_v47 = vmul.f32 %v2531_v11, %v645_v28  ;;  %v789_v49 = vadd.f32 %v717_v27, %v570_v38  ;;  %v1155_v50 = vmul.f32 %v2544_v24, %v1082_v34  ;;  %v350_v3 = vld [vmem:[#allocation2 + $0x210] sm:$0xff]  ;;  %v429_v10 = vld [vmem:[%s2520_s9 + $0x288] sm:$0xff] }
  0xde   : >> { %1515 = vst [vmem:[#allocation2 + $0x218] sm:$0xff] %v1443_v37  ;;  %v571_v51 = vadd.f32 %v499_v40, %v348_v35  ;;  %v937_v52 = vmul.f32 %v2537_v16, %v864_v36  ;;  %v1444_v56 = vadd.f32 %v1372_v31, %v1225_v43  ;;  %v500_v59 = vmul.f32 %v2527_v7, %v427_v41  ;;  %v648_v12 = vld [vmem:[%s2520_s9 + $0x289] sm:$0xff]  ;;  %v649_v34 = vld [vmem:[%s2520_s9 + $0x291] sm:$0xff] }
  0xdf   : >> { %v1226_v57 = vadd.f32 %v1154_v33, %v1007_v44  ;;  %v719_v60 = vmul.f32 %v2531_v11, %v646_v42  ;;  %v1008_v62 = vadd.f32 %v936_v39, %v789_v49  ;;  %v1374_v63 = vmul.f32 %v2549_v29, %v1301_v46  ;;  %v1085_v19 = vld [vmem:[%s2520_s9 + $0x283] sm:$0xff]  ;;  %v351_v25 = vld [vmem:[#allocation2 + $0x1d0] sm:$0xff] }
  0xe0   : >> { %v790_v0 = vadd.f32 %v718_v47, %v571_v51  ;;  %v1156_v1 = vmul.f32 %v2544_v24, %v1083_v48  ;;  %1516 = vst [vmem:[#allocation2 + $0x200] sm:$0xff] %v1444_v56  ;;  %v572_v6 = vadd.f32 %v500_v59, %v349_v53  ;;  %v938_v8 = vmul.f32 %v2537_v16, %v865_v54  ;;  %v430_v27 = vld [vmem:[%s2520_s9 + $0x290] sm:$0xff]  ;;  %v1304_v31 = vld [vmem:[%s2520_s9 + $0x284] sm:$0xff] }
  0xe1   : >> { %v1445_v5 = vadd.f32 %v1373_v45, %v1226_v57  ;;  %v501_v9 = vmul.f32 %v2527_v7, %v428_v55  ;;  %v1227_v13 = vadd.f32 %v1155_v50, %v1008_v62  ;;  %v1375_v15 = vmul.f32 %v2549_v29, %v1302_v58  ;;  %v1086_v39 = vld [vmem:[%s2520_s9 + $0x28b] sm:$0xff]  ;;  %v431_v46 = vld [vmem:[%s2520_s9 + $0x2a0] sm:$0xff]  ;;  %v1087_v53 = vld [vmem:[%s2520_s9 + $0x293] sm:$0xff] }
  0xe2   : >> { %v1009_v14 = vadd.f32 %v937_v52, %v790_v0  ;;  %v720_v18 = vmul.f32 %v2531_v11, %v647_v61  ;;  %v791_v20 = vadd.f32 %v719_v60, %v572_v6  ;;  %v1157_v21 = vmul.f32 %v2544_v24, %v1084_v2  ;;  %v352_v40 = vld [vmem:[#allocation2 + $0x168] sm:$0xff]  ;;  %v868_v41 = vld [vmem:[%s2520_s9 + $0x292] sm:$0xff]  ;;  %v353_v58 = vld [vmem:[#allocation2 + $0xc0] sm:$0xff] }
  0xe3   : >> { %1517 = vst [vmem:[#allocation2 + $0x10] sm:$0xff] %v1445_v5  ;;  %v573_v22 = vadd.f32 %v501_v9, %v350_v3  ;;  %v939_v23 = vmul.f32 %v2537_v16, %v866_v4  ;;  %v1446_v28 = vadd.f32 %v1374_v63, %v1227_v13  ;;  %v502_v32 = vmul.f32 %v2527_v7, %v429_v10  ;;  %v650_v47 = vld [vmem:[%s2520_s9 + $0x2a1] sm:$0xff]  ;;  %v1305_v51 = vld [vmem:[%s2520_s9 + $0x28c] sm:$0xff]  ;;  %v1306_v63 = vld [vmem:[%s2520_s9 + $0x294] sm:$0xff] }
  0xe4   : >> { %v1228_v30 = vadd.f32 %v1156_v1, %v1009_v14  ;;  %v721_v33 = vmul.f32 %v2531_v11, %v648_v12  ;;  %v1010_v35 = vadd.f32 %v938_v8, %v791_v20  ;;  %v1376_v36 = vmul.f32 %v2549_v29, %v1303_v17  ;;  %v869_v59 = vld [vmem:[%s2520_s9 + $0x2a2] sm:$0xff]  ;;  %v870_v10 = vld [vmem:[%s2520_s9 + $0x2aa] sm:$0xff] }
  0xe5   : >> { %v792_v37 = vadd.f32 %v720_v18, %v573_v22  ;;  %v1158_v38 = vmul.f32 %v2544_v24, %v1085_v19  ;;  %1518 = vst [vmem:[#allocation2 + $0x128] sm:$0xff] %v1446_v28  ;;  %v574_v43 = vadd.f32 %v502_v32, %v351_v25  ;;  %v940_v44 = vmul.f32 %v2537_v16, %v867_v26  ;;  %v432_v60 = vld [vmem:[%s2520_s9 + $0x2a8] sm:$0xff]  ;;  %v354_v9 = vld [vmem:[#allocation2 + $0x1a0] sm:$0xff]  ;;  %v433_v17 = vld [vmem:[%s2520_s9 + $0x2b0] sm:$0xff] }
  0xe6   : >> { %v1447_v42 = vadd.f32 %v1375_v15, %v1228_v30  ;;  %v503_v45 = vmul.f32 %v2527_v7, %v430_v27  ;;  %v1229_v48 = vadd.f32 %v1157_v21, %v1010_v35  ;;  %v1377_v50 = vmul.f32 %v2549_v29, %v1304_v31  ;;  %v651_v2 = vld [vmem:[%s2520_s9 + $0x2a9] sm:$0xff]  ;;  %v652_v18 = vld [vmem:[%s2520_s9 + $0x2b1] sm:$0xff] }
  0xe7   : >> { %v1011_v49 = vadd.f32 %v939_v23, %v792_v37  ;;  %v722_v52 = vmul.f32 %v2531_v11, %v649_v34  ;;  %v793_v54 = vadd.f32 %v721_v33, %v574_v43  ;;  %v1159_v55 = vmul.f32 %v2544_v24, %v1086_v39  ;;  %v1088_v8 = vld [vmem:[%s2520_s9 + $0x2a3] sm:$0xff]  ;;  %v1089_v25 = vld [vmem:[%s2520_s9 + $0x2ab] sm:$0xff]  ;;  %v355_v31 = vld [vmem:[#allocation2 + $0x58] sm:$0xff] }
  0xe8   : >> { %1519 = vst [vmem:[#allocation2 + $0x178] sm:$0xff] %v1447_v42  ;;  %v575_v56 = vadd.f32 %v503_v45, %v352_v40  ;;  %v941_v57 = vmul.f32 %v2537_v16, %v868_v41  ;;  %v1448_v61 = vadd.f32 %v1376_v36, %v1229_v48  ;;  %v504_v0 = vmul.f32 %v2527_v7, %v431_v46  ;;  %v1307_v22 = vld [vmem:[%s2520_s9 + $0x2a4] sm:$0xff]  ;;  %v871_v32 = vld [vmem:[%s2520_s9 + $0x2b2] sm:$0xff] }
  0xe9   : >> { %v1230_v62 = vadd.f32 %v1158_v38, %v1011_v49  ;;  %v723_v1 = vmul.f32 %v2531_v11, %v650_v47  ;;  %v1012_v3 = vadd.f32 %v940_v44, %v793_v54  ;;  %v1378_v4 = vmul.f32 %v2549_v29, %v1305_v51  ;;  %v434_v33 = vld [vmem:[%s2520_s9 + $0x2c0] sm:$0xff]  ;;  %v1308_v36 = vld [vmem:[%s2520_s9 + $0x2ac] sm:$0xff]  ;;  %v356_v45 = vld [vmem:[#allocation2 + $0x118] sm:$0xff] }
  0xea   : >> { %v794_v5 = vadd.f32 %v722_v52, %v575_v56  ;;  %v1160_v6 = vmul.f32 %v2544_v24, %v1087_v53  ;;  %1520 = vst [vmem:[#allocation2 + $0x208] sm:$0xff] %v1448_v61  ;;  %v576_v13 = vadd.f32 %v504_v0, %v353_v58  ;;  %v942_v14 = vmul.f32 %v2537_v16, %v869_v59  ;;  %v653_v39 = vld [vmem:[%s2520_s9 + $0x2c1] sm:$0xff]  ;;  %v1090_v44 = vld [vmem:[%s2520_s9 + $0x2b3] sm:$0xff]  ;;  %v654_v52 = vld [vmem:[%s2520_s9 + $0x2c9] sm:$0xff] }
  0xeb   : >> { %v1449_v12 = vadd.f32 %v1377_v50, %v1230_v62  ;;  %v505_v15 = vmul.f32 %v2527_v7, %v432_v60  ;;  %v1231_v19 = vadd.f32 %v1159_v55, %v1012_v3  ;;  %v1379_v21 = vmul.f32 %v2549_v29, %v1306_v63  ;;  %v872_v46 = vld [vmem:[%s2520_s9 + $0x2c2] sm:$0xff]  ;;  %v1309_v56 = vld [vmem:[%s2520_s9 + $0x2b4] sm:$0xff]  ;;  %v873_v0 = vld [vmem:[%s2520_s9 + $0x2ca] sm:$0xff] }
  0xec   : >> { %v1013_v20 = vadd.f32 %v941_v57, %v794_v5  ;;  %v724_v23 = vmul.f32 %v2531_v11, %v651_v2  ;;  %v795_v26 = vadd.f32 %v723_v1, %v576_v13  ;;  %v1161_v27 = vmul.f32 %v2544_v24, %v1088_v8  ;;  %v435_v51 = vld [vmem:[%s2520_s9 + $0x2c8] sm:$0xff]  ;;  %v357_v63 = vld [vmem:[#allocation2 + $0x20] sm:$0xff]  ;;  %v436_v1 = vld [vmem:[%s2520_s9 + $0x2d0] sm:$0xff] }
  0xed   : >> { %1521 = vst [vmem:[#allocation2 + $0x210] sm:$0xff] %v1449_v12  ;;  %v577_v28 = vadd.f32 %v505_v15, %v354_v9  ;;  %v943_v30 = vmul.f32 %v2537_v16, %v870_v10  ;;  %v1450_v34 = vadd.f32 %v1378_v4, %v1231_v19  ;;  %v506_v37 = vmul.f32 %v2527_v7, %v433_v17  ;;  %v1091_v58 = vld [vmem:[%s2520_s9 + $0x2c3] sm:$0xff]  ;;  %v655_v8 = vld [vmem:[%s2520_s9 + $0x2d1] sm:$0xff] }
  0xee   : >> { %v1232_v35 = vadd.f32 %v1160_v6, %v1013_v20  ;;  %v725_v38 = vmul.f32 %v2531_v11, %v652_v18  ;;  %v1014_v40 = vadd.f32 %v942_v14, %v795_v26  ;;  %v1380_v41 = vmul.f32 %v2549_v29, %v1307_v22  ;;  %v1310_v4 = vld [vmem:[%s2520_s9 + $0x2c4] sm:$0xff]  ;;  %v874_v17 = vld [vmem:[%s2520_s9 + $0x2d2] sm:$0xff] }
  0xef   : >> { %v796_v42 = vadd.f32 %v724_v23, %v577_v28  ;;  %v1162_v43 = vmul.f32 %v2544_v24, %v1089_v25  ;;  %1522 = vst [vmem:[#allocation2 + $0x1d0] sm:$0xff] %v1450_v34  ;;  %v578_v48 = vadd.f32 %v506_v37, %v355_v31  ;;  %v944_v49 = vmul.f32 %v2537_v16, %v871_v32  ;;  %v1092_v14 = vld [vmem:[%s2520_s9 + $0x2cb] sm:$0xff]  ;;  %v437_v22 = vld [vmem:[%s2520_s9 + $0x2e0] sm:$0xff]  ;;  %v1093_v31 = vld [vmem:[%s2520_s9 + $0x2d3] sm:$0xff] }
  0xf0   : >> { %v1451_v47 = vadd.f32 %v1379_v21, %v1232_v35  ;;  %v507_v50 = vmul.f32 %v2527_v7, %v434_v33  ;;  %v1233_v53 = vadd.f32 %v1161_v27, %v1014_v40  ;;  %v1381_v55 = vmul.f32 %v2549_v29, %v1308_v36  ;;  %v358_v15 = vld [vmem:[#allocation2 + $0x148] sm:$0xff] }
  0xf1   : >> { %v1015_v54 = vadd.f32 %v943_v30, %v796_v42  ;;  %v726_v57 = vmul.f32 %v2531_v11, %v653_v39  ;;  %v797_v59 = vadd.f32 %v725_v38, %v578_v48  ;;  %v1163_v60 = vmul.f32 %v2544_v24, %v1090_v44  ;;  %v656_v23 = vld [vmem:[%s2520_s9 + $0x2e1] sm:$0xff]  ;;  %v1311_v28 = vld [vmem:[%s2520_s9 + $0x2cc] sm:$0xff] }
  0xf2   : >> { %1523 = vst [vmem:[#allocation2 + $0x168] sm:$0xff] %v1451_v47  ;;  %v579_v61 = vadd.f32 %v507_v50, %v356_v45  ;;  %v945_v62 = vmul.f32 %v2537_v16, %v872_v46  ;;  %v1452_v2 = vadd.f32 %v1380_v41, %v1233_v53  ;;  %v508_v5 = vmul.f32 %v2527_v7, %v435_v51  ;;  %v359_v36 = vld [vmem:[#allocation2 + $0xa8] sm:$0xff]  ;;  %v1312_v41 = vld [vmem:[%s2520_s9 + $0x2d4] sm:$0xff] }
  0xf3   : >> { %v1234_v3 = vadd.f32 %v1162_v43, %v1015_v54  ;;  %v727_v6 = vmul.f32 %v2531_v11, %v654_v52  ;;  %v1016_v9 = vadd.f32 %v944_v49, %v797_v59  ;;  %v1382_v10 = vmul.f32 %v2549_v29, %v1309_v56  ;;  %v875_v37 = vld [vmem:[%s2520_s9 + $0x2e2] sm:$0xff]  ;;  %v360_v50 = vld [vmem:[#allocation2 + $0x150] sm:$0xff] }
  0xf4   : >> { %v798_v12 = vadd.f32 %v726_v57, %v579_v61  ;;  %v1164_v13 = vmul.f32 %v2544_v24, %v1091_v58  ;;  %1524 = vst [vmem:[#allocation2 + $0xc0] sm:$0xff] %v1452_v2  ;;  %v580_v19 = vadd.f32 %v508_v5, %v357_v63  ;;  %v946_v20 = vmul.f32 %v2537_v16, %v873_v0  ;;  %v438_v38 = vld [vmem:[%s2520_s9 + $0x2e8] sm:$0xff]  ;;  %v439_v56 = vld [vmem:[%s2520_s9 + $0x2f0] sm:$0xff] }
  0xf5   : >> { %v1453_v18 = vadd.f32 %v1381_v55, %v1234_v3  ;;  %v509_v21 = vmul.f32 %v2527_v7, %v436_v1  ;;  %v1235_v25 = vadd.f32 %v1163_v60, %v1016_v9  ;;  %v1383_v27 = vmul.f32 %v2549_v29, %v1310_v4  ;;  %v657_v44 = vld [vmem:[%s2520_s9 + $0x2e9] sm:$0xff]  ;;  %v658_v57 = vld [vmem:[%s2520_s9 + $0x2f1] sm:$0xff]  ;;  %v361_v4 = vld [vmem:[#allocation2 + $0xa0] sm:$0xff] }
  0xf6   : >> { %v1017_v26 = vadd.f32 %v945_v62, %v798_v12  ;;  %v728_v30 = vmul.f32 %v2531_v11, %v655_v8  ;;  %v799_v32 = vadd.f32 %v727_v6, %v580_v19  ;;  %v1165_v33 = vmul.f32 %v2544_v24, %v1092_v14  ;;  %v1094_v49 = vld [vmem:[%s2520_s9 + $0x2e3] sm:$0xff]  ;;  %v1095_v63 = vld [vmem:[%s2520_s9 + $0x2eb] sm:$0xff] }
  0xf7   : >> { %1525 = vst [vmem:[#allocation2 + $0x1a0] sm:$0xff] %v1453_v18  ;;  %v581_v34 = vadd.f32 %v509_v21, %v358_v15  ;;  %v947_v35 = vmul.f32 %v2537_v16, %v874_v17  ;;  %v1454_v39 = vadd.f32 %v1382_v10, %v1235_v25  ;;  %v510_v42 = vmul.f32 %v2527_v7, %v437_v22  ;;  %v876_v51 = vld [vmem:[%s2520_s9 + $0x2ea] sm:$0xff]  ;;  %v877_v5 = vld [vmem:[%s2520_s9 + $0x2f2] sm:$0xff] }
  0xf8   : >> { %v1236_v40 = vadd.f32 %v1164_v13, %v1017_v26  ;;  %v729_v43 = vmul.f32 %v2531_v11, %v656_v23  ;;  %v1018_v45 = vadd.f32 %v946_v20, %v799_v32  ;;  %v1384_v46 = vmul.f32 %v2549_v29, %v1311_v28  ;;  %v1313_v61 = vld [vmem:[%s2520_s9 + $0x2e4] sm:$0xff]  ;;  %v1314_v9 = vld [vmem:[%s2520_s9 + $0x2ec] sm:$0xff]  ;;  %v1315_v26 = vld [vmem:[%s2520_s9 + $0x2f4] sm:$0xff] }
  0xf9   : >> { %v800_v47 = vadd.f32 %v728_v30, %v581_v34  ;;  %v1166_v48 = vmul.f32 %v2544_v24, %v1093_v31  ;;  %1526 = vst [vmem:[#allocation2 + $0x58] sm:$0xff] %v1454_v39  ;;  %v582_v53 = vadd.f32 %v510_v42, %v359_v36  ;;  %v948_v54 = vmul.f32 %v2537_v16, %v875_v37  ;;  %v1096_v18 = vld [vmem:[%s2520_s9 + $0x2f3] sm:$0xff]  ;;  %v1536_v36 = vld [vmem:[#allocation2 + $0x28] sm:$0xff] (%p286_p2) }
  0xfa   : >> { %v1455_v52 = vadd.f32 %v1383_v27, %v1236_v40  ;;  %v511_v55 = vmul.f32 %v2527_v7, %v438_v38  ;;  %v1237_v58 = vadd.f32 %v1165_v33, %v1018_v45  ;;  %v1385_v60 = vmul.f32 %v2549_v29, %v1312_v41  ;;  %v1537_v37 = vld [vmem:[#allocation2 + $0xe8] sm:$0xff] (%p286_p2)  ;;  %v1538_v38 = vld [vmem:[#allocation2 + $0xf0] sm:$0xff] (%p286_p2)  ;;  %v1541_v42 = vld [vmem:[#allocation2 + $0xd8] sm:$0xff] (%p286_p2) }
  0xfb   : >> { %v1019_v59 = vadd.f32 %v947_v35, %v800_v47  ;;  %v730_v62 = vmul.f32 %v2531_v11, %v657_v44  ;;  %v801_v0 = vadd.f32 %v729_v43, %v582_v53  ;;  %v1167_v1 = vmul.f32 %v2544_v24, %v1094_v49  ;;  %v1534_v35 = vld [vmem:[#allocation2 + $0x8] sm:$0xff] (%p286_p2)  ;;  %v1539_v39 = vld [vmem:[#allocation2 + $0x70] sm:$0xff] (%p286_p2)  ;;  %v1542_v43 = vld [vmem:[#allocation2 + $0x18] sm:$0xff] (%p286_p2) }
  0xfc   : >> { %1527 = vst [vmem:[#allocation2 + $0x118] sm:$0xff] %v1455_v52  ;;  %v583_v2 = vadd.f32 %v511_v55, %v360_v50  ;;  %v949_v3 = vmul.f32 %v2537_v16, %v876_v51  ;;  %v1456_v6 = vadd.f32 %v1384_v46, %v1237_v58  ;;  %v512_v10 = vmul.f32 %v2527_v7, %v439_v56  ;;  %v1543_v44 = vld [vmem:[#allocation2 + $0xb0] sm:$0xff] (%p286_p2)  ;;  %v1545_v46 = vld [vmem:[#allocation2 + $0x108] sm:$0xff] (%p286_p2)  ;;  %v1548_v51 = vld [vmem:[#allocation2 + $0xb8] sm:$0xff] (%p286_p2) }
  0xfd   : >> { %v1238_v8 = vadd.f32 %v1166_v48, %v1019_v59  ;;  %v731_v12 = vmul.f32 %v2531_v11, %v658_v57  ;;  %v1020_v13 = vadd.f32 %v948_v54, %v801_v0  ;;  %v1386_v14 = vmul.f32 %v2549_v29, %v1313_v61  ;;  %v1546_v47 = vld [vmem:[#allocation2 + $0x110] sm:$0xff] (%p286_p2)  ;;  %v1547_v48 = vld [vmem:[#allocation2 + $0x1f8] sm:$0xff] (%p286_p2)  ;;  %v1549_v52 = vld [vmem:[#allocation2 + $0x180] sm:$0xff] (%p286_p2) }
  0xfe   : >> { %v802_v15 = vadd.f32 %v730_v62, %v583_v2  ;;  %v1168_v17 = vmul.f32 %v2544_v24, %v1095_v63  ;;  %1528 = vst [vmem:[#allocation2 + $0x20] sm:$0xff] %v1456_v6  ;;  %v584_v20 = vadd.f32 %v512_v10, %v361_v4  ;;  %v950_v21 = vmul.f32 %v2537_v16, %v877_v5  ;;  %v1533_v16 = vld [vmem:[#allocation2 + $0xc8] sm:$0xff] (%p286_p2)  ;;  %v1550_v53 = vld [vmem:[#allocation2 + $0x190] sm:$0xff] (%p286_p2)  ;;  %v1551_v54 = vld [vmem:[#allocation2 + $0x140] sm:$0xff] (%p286_p2) }
  0xff   : >> { %v1457_v19 = vadd.f32 %v1385_v60, %v1238_v8  ;;  %v1239_v22 = vadd.f32 %v1167_v1, %v1020_v13  ;;  %v1387_v25 = vmul.f32 %v2549_v29, %v1314_v9  ;;  %v1169_v11 = vmul.f32 %v2544_v24, %v1096_v18  ;;  %v1535_v24 = vld [vmem:[#allocation2 + $0x40] sm:$0xff] (%p286_p2)  ;;  %v1553_v56 = vld [vmem:[#allocation2 + $0xd0] sm:$0xff] (%p286_p2)  ;;  %v1544_v59 = vld [vmem:[#allocation2 + $0x158] sm:$0xff] (%p286_p2) }
 0x100   : >> { %v1021_v23 = vadd.f32 %v949_v3, %v802_v15  ;;  %v803_v7 = vadd.f32 %v731_v12, %v584_v20  ;;  %v1388_v31 = vmul.f32 %v2549_v29, %v1315_v26  ;;  %v1540_v29 = vld [vmem:[#allocation2 + $0x120] sm:$0xff] (%p286_p2)  ;;  %v1605_v40 = vmax.f32 (%p286_p2), %v1533_v16, %v1536_v36  ;;  %v1554_v60 = vld [vmem:[#allocation2 + $0x138] sm:$0xff] (%p286_p2)  ;;  %v1557_v2 = vld [vmem:[#allocation2 + $0x88] sm:$0xff] (%p286_p2) }
 0x101   : >> { %1529 = vst [vmem:[#allocation2 + $0x148] sm:$0xff] %v1457_v19  ;;  %v1458_v27 = vadd.f32 %v1386_v14, %v1239_v22  ;;  %v1608_v41 = vmax.f32 (%p286_p2), %v1534_v35, %v1537_v37  ;;  %v1611_v45 = vmax.f32 (%p286_p2), %v1535_v24, %v1538_v38  ;;  %v1552_v55 = vld [vmem:[#allocation2 + $0x1c0] sm:$0xff] (%p286_p2)  ;;  %v1614_v58 = vmax.f32 (%p286_p2), %v1545_v46, %v1548_v51  ;;  %v1559_v4 = vld [vmem:[#allocation2 + $0x188] sm:$0xff] (%p286_p2)  ;;  %v1556_v9 = vld [vmem:[#allocation2 + $0x1b8] sm:$0xff] (%p286_p2) }
 0x102   : >> { %v1240_v28 = vadd.f32 %v1168_v17, %v1021_v23  ;;  %v1022_v30 = vadd.f32 %v950_v21, %v803_v7  ;;  %v1606_v49 = vmax.f32 (%p286_p2), %v1605_v40, %v1539_v39  ;;  %v1617_v63 = vmax.f32 (%p286_p2), %v1546_v47, %v1549_v52  ;;  %v1555_v1 = vld [vmem:[#allocation2 + $0x60] sm:$0xff] (%p286_p2)  ;;  %v1560_v10 = vld [vmem:[#allocation2 + $0x38] sm:$0xff] (%p286_p2)  ;;  %v1561_v12 = vld [vmem:[#allocation2 + $0x1a8] sm:$0xff] (%p286_p2) }
 0x103   : >> { %1530 = vst [vmem:[#allocation2 + $0xa8] sm:$0xff] %v1458_v27  ;;  %v1609_v50 = vmax.f32 (%p286_p2), %v1608_v41, %v1540_v29  ;;  %v1612_v62 = vmax.f32 (%p286_p2), %v1611_v45, %v1541_v42  ;;  %v1620_v0 = vmax.f32 (%p286_p2), %v1547_v48, %v1550_v53  ;;  %v1558_v3 = vld [vmem:[#allocation2] sm:$0xff] (%p286_p2)  ;;  %v1615_v5 = vmax.f32 (%p286_p2), %v1614_v58, %v1551_v54  ;;  %v1563_v19 = vld [vmem:[#allocation2 + $0x1e8] sm:$0xff] (%p286_p2)  ;;  %v1566_v7 = vld [vmem:[#allocation2 + $0xf8] sm:$0xff] (%p286_p2) }
 0x104   : >> { %v1459_v32 = vadd.f32 %v1387_v25, %v1240_v28  ;;  %v1241_v33 = vadd.f32 %v1169_v11, %v1022_v30  ;;  %288 = sbr.rel (!%p286_p2) target bundleno = 66 (0x42), region = 82  ;;  %v1607_v57 = vmax.f32 (%p286_p2), %v1606_v49, %v1542_v43  ;;  %v1562_v13 = vld [vmem:[#allocation2 + $0x220] sm:$0xff] (%p286_p2)  ;;  %v1618_v14 = vmax.f32 (%p286_p2), %v1617_v63, %v1552_v55  ;;  %v1564_v20 = vld [vmem:[#allocation2 + $0x1c8] sm:$0xff] (%p286_p2)  ;;  %v1567_v11 = vld [vmem:[#allocation2 + $0x78] sm:$0xff] (%p286_p2) }
 0x105   : > { %v3255_v61 = vmax.f32 (%p286_p2), %v1609_v50, %v1543_v44  ;;  %v1621_v15 = vmax.f32 (%p286_p2), %v1620_v0, %v1553_v56  ;;  %v1565_v21 = vld [vmem:[#allocation2 + $0x80] sm:$0xff] (%p286_p2)  ;;  %v3259_v22 = vmax.f32 (%p286_p2), %v1615_v5, %v1554_v60  ;;  %v1623_v23 = vmax.f32 (%p286_p2), %v1557_v2, %v1560_v10  ;;  %v1568_v27 = vld [vmem:[#allocation2 + $0x170] sm:$0xff] (%p286_p2)  ;;  %v1573_v39 = vld [vmem:[#allocation2 + $0x48] sm:$0xff] (%p286_p2) }
 0x106   : >> { %1531 = vst [vmem:[#allocation2 + $0x150] sm:$0xff] %v1459_v32  ;;  %v1460_v34 = vadd.f32 %v1388_v31, %v1241_v33  ;;  %v1660_v6 = vsel (%p286_p2), %vm1659_vm0, %v1607_v57, -inf  ;;  %v1727_v8 = vsel (%p286_p2), %vm1726_vm1, %v1607_v57, -inf  ;;  %v1626_v25 = vmax.f32 (%p286_p2), %v1558_v3, %v1561_v12  ;;  %v1569_v33 = vld [vmem:[#allocation2 + $0x198] sm:$0xff] (%p286_p2)  ;;  %v1571_v16 = vld [vmem:[#allocation2 + $0x1e0] sm:$0xff] (%p286_p2)  ;;  %v1572_v38 = vld [vmem:[#allocation2 + $0x1f0] sm:$0xff] (%p286_p2) }
 0x107   : > { %v1661_v17 = vrot.slane (%p286_p2), %v1660_v6, 4  ;;  %v1728_v18 = vrot.slane (%p286_p2), %v1727_v8, 4  ;;  %v1629_v26 = vmax.f32 (%p286_p2), %v1559_v4, %v1562_v13  ;;  %v3261_v28 = vmax.f32 (%p286_p2), %v1612_v62, %v1544_v59  ;;  %v1574_v29 = vld [vmem:[#allocation2 + $0x98] sm:$0xff] (%p286_p2)  ;;  %v1576_v45 = vld [vmem:[#allocation2 + $0x160] sm:$0xff] (%p286_p2)  ;;  %v1577_v46 = vld [vmem:[#allocation2 + $0x50] sm:$0xff] (%p286_p2) }
 0x108   : >> { %1532 = vst [vmem:[#allocation2 + $0xa0] sm:$0xff] %v1460_v34  ;;  %v3265_v32 = vsel (%p286_p2), %vm1659_vm0, %v3255_v61, -inf  ;;  %v1570_v34 = vld [vmem:[#allocation2 + $0xe0] sm:$0xff] (%p286_p2)  ;;  %v1624_v35 = vmax.f32 (%p286_p2), %v1623_v23, %v1563_v19  ;;  %v1627_v24 = vmax.f32 (%p286_p2), %v1626_v25, %v1564_v20  ;;  %v1667_v37 = vsel (%p286_p2), %vm1659_vm0, %v3259_v22, -inf  ;;  %v1575_v44 = vld [vmem:[#allocation2 + $0x238] sm:$0xff] (%p286_p2)  ;;  %v1579_v52 = vld [vmem:[#allocation2 + $0x30] sm:$0xff] (%p286_p2) }
 0x109   : > { %v1662_v30 = vmax.f32 %v1660_v6, %v1661_v17  ;;  %v1729_v31 = vmax.f32 %v1727_v8, %v1728_v18  ;;  %v1630_v36 = vmax.f32 %v1629_v26, %v1565_v21  ;;  %v3269_v40 = vmax.f32 %v1618_v14, %v1555_v1  ;;  %v1578_v51 = vld [vmem:[#allocation2 + $0x100] sm:$0xff]  ;;  %v1580_v57 = vld [vmem:[#allocation2 + $0x1b0] sm:$0xff]  ;;  %v1583_v60 = vld [vmem:[#allocation2 + $0x68] sm:$0xff] }
 0x10a   : > { %v1668_v42 = vrot.slane %v1667_v37, 4  ;;  %v3271_v47 = vmax.f32 %v1621_v15, %v1556_v9  ;;  %v3273_v48 = vmax.f32 %v1624_v35, %v1566_v7  ;;  %v3275_v49 = vmax.f32 %v1627_v24, %v1567_v11  ;;  %v1581_v58 = vld [vmem:[#allocation2 + $0x90] sm:$0xff]  ;;  %v1585_v3 = vld [vmem:[#allocation2 + $0x1d8] sm:$0xff]  ;;  %v1586_v4 = vld [vmem:[#allocation2 + $0x228] sm:$0xff] }
 0x10b   : > { %v1663_v41 = vrot.slane %v1662_v30, 2  ;;  %v1730_v43 = vrot.slane %v1729_v31, 2  ;;  %v1632_v50 = vmax.f32 %v1569_v33, %v1572_v38  ;;  %v1635_v53 = vmax.f32 %v1570_v34, %v1573_v39  ;;  %v1582_v59 = vld [vmem:[#allocation2 + $0x130] sm:$0xff]  ;;  %v1587_v10 = vld [vmem:[#allocation2 + $0x218] sm:$0xff]  ;;  %v1588_v12 = vld [vmem:[#allocation2 + $0x200] sm:$0xff] }
 0x10c   : > { %v1638_v54 = vmax.f32 %v1571_v16, %v1574_v29  ;;  %v1669_v56 = vmax.f32 %v1667_v37, %v1668_v42  ;;  %v3277_v62 = vmax.f32 %v1630_v36, %v1568_v27  ;;  %v1674_v0 = vsel %vm1659_vm0, %v3273_v48, -inf  ;;  %v1584_v2 = vld [vmem:[#allocation2 + $0x230] sm:$0xff]  ;;  %v1590_v19 = vld [vmem:[#allocation2 + $0x128] sm:$0xff]  ;;  %v1591_v20 = vld [vmem:[#allocation2 + $0x178] sm:$0xff] }
 0x10d   : > { %v1664_v55 = vmax.f32 %v1662_v30, %v1663_v41  ;;  %v1633_v63 = vmax.f32 %v1632_v50, %v1575_v44  ;;  %v3281_v1 = vmax.f32 %v1729_v31, %v1730_v43  ;;  %v1636_v5 = vmax.f32 %v1635_v53, %v1576_v45  ;;  %v1589_v13 = vld [vmem:[#allocation2 + $0x10] sm:$0xff]  ;;  %v1592_v21 = vld [vmem:[#allocation2 + $0x208] sm:$0xff]  ;;  %v1596_v35 = vld [vmem:[#allocation2 + $0xc0] sm:$0xff] }
 0x10e   : > { %v1639_v6 = vmax.f32 %v1638_v54, %v1577_v46  ;;  %v1670_v9 = vrot.slane %v1669_v56, 2  ;;  %v1641_v15 = vmax.f32 %v1581_v58, %v1584_v2  ;;  %v1644_v17 = vmax.f32 %v1582_v59, %v1585_v3  ;;  %v1593_v11 = vld [vmem:[#allocation2 + $0x210] sm:$0xff]  ;;  %v1595_v30 = vld [vmem:[#allocation2 + $0x168] sm:$0xff]  ;;  %v1597_v24 = vld [vmem:[#allocation2 + $0x1a0] sm:$0xff] }
 0x10f   : > { %v1665_v8 = vrot.slane %v1664_v55, 1  ;;  %v3283_v14 = vmax.f32 %v1633_v63, %v1578_v51  ;;  %v1647_v18 = vmax.f32 %v1583_v60, %v1586_v4  ;;  %v3285_v23 = vmax.f32 %v1636_v5, %v1579_v52  ;;  %v1594_v27 = vld [vmem:[#allocation2 + $0x1d0] sm:$0xff]  ;;  %v1598_v36 = vld [vmem:[#allocation2 + $0x58] sm:$0xff]  ;;  %v1600_v42 = vld [vmem:[#allocation2 + $0x20] sm:$0xff] }
 0x110   : > { %v1671_v26 = vmax.f32 %v1669_v56, %v1670_v9  ;;  %v1734_v7 = vsel %vm1726_vm1, %v3259_v22, -inf  ;;  %v1642_v31 = vmax.f32 %v1641_v15, %v1587_v10  ;;  %v1645_v33 = vmax.f32 %v1644_v17, %v1588_v12  ;;  %v1599_v41 = vld [vmem:[#allocation2 + $0x118] sm:$0xff]  ;;  %v1601_v22 = vld [vmem:[#allocation2 + $0x148] sm:$0xff]  ;;  %v1604_v56 = vld [vmem:[#allocation2 + $0xa0] sm:$0xff] }
 0x111   : > { %v1666_v25 = vmax.f32 %v1664_v55, %v1665_v8  ;;  %v1648_v34 = vmax.f32 %v1647_v18, %v1589_v13  ;;  %v1675_v16 = vrot.slane %v1674_v0, 4  ;;  %v3289_v37 = vmax.f32 %v1639_v6, %v1580_v57  ;;  %v1602_v50 = vld [vmem:[#allocation2 + $0xa8] sm:$0xff]  ;;  %v1603_v55 = vld [vmem:[#allocation2 + $0x150] sm:$0xff] }
 0x112   : > { %v1672_v38 = vrot.slane %v1671_v26, 1  ;;  %v1681_v39 = vsel %vm1659_vm0, %v3283_v14, -inf  ;;  %v1643_v43 = vmax.f32 %v1642_v31, %v1590_v19  ;;  %v3293_v44 = vmax.f32 %v1645_v33, %v1591_v20 }
 0x113   : > { %v1702_v29 = vmax.f32 %v1666_v25, 0.0  ;;  %v3295_v45 = vmax.f32 %v1648_v34, %v1592_v21  ;;  %v1650_v46 = vmax.f32 %v1593_v11, %v1596_v35  ;;  %v1653_v51 = vmax.f32 %v1594_v27, %v1597_v24 }
 0x114   : > { %v1656_v52 = vmax.f32 %v1595_v30, %v1598_v36  ;;  %v1673_v53 = vmax.f32 %v1671_v26, %v1672_v38  ;;  %v1676_v54 = vmax.f32 %v1674_v0, %v1675_v16  ;;  %v1682_v58 = vrot.slane %v1681_v39, 4 }
 0x115   : > { %v1651_v57 = vmax.f32 %v1650_v46, %v1599_v41  ;;  %v1688_v59 = vsel %vm1659_vm0, %v1643_v43, -inf  ;;  %v1732_v60 = vrot.slane %v3281_v1, 1  ;;  %v1654_v63 = vmax.f32 %v1653_v51, %v1600_v42 }
 0x116   : > { %v1657_v2 = vmax.f32 %v1656_v52, %v1601_v22  ;;  %v1677_v3 = vrot.slane %v1676_v54, 2  ;;  %v1689_v4 = vrot.slane %v1688_v59, 4  ;;  %v1683_v6 = vmax.f32 %v1681_v39, %v1682_v58 }
 0x117   : > { %v1652_v5 = vmax.f32 %v1651_v57, %v1602_v50  ;;  %v1703_v8 = vmax.f32 %v1673_v53, 0.0  ;;  %v3300_v9 = vmax.f32 %v3281_v1, %v1732_v60  ;;  %v3302_v0 = vmax.f32 %v1654_v63, %v1603_v55 }
 0x118   : > { %v3304_v10 = vmax.f32 %v1657_v2, %v1604_v56  ;;  %v1678_v12 = vmax.f32 %v1676_v54, %v1677_v3  ;;  %v1690_v13 = vmax.f32 %v1688_v59, %v1689_v4  ;;  %v1684_v15 = vrot.slane %v1683_v6, 2 }
 0x119   : > { %v1695_v17 = vsel %vm1659_vm0, %v1652_v5, -inf  ;;  %v1715_v18 = vsel %vm1714_vm2, %v1703_v8, %v1702_v29  ;;  %v1735_v19 = vrot.slane %v1734_v7, 4  ;;  %v1741_v1 = vsel %vm1726_vm1, %v3273_v48, -inf }
 0x11a   : > { %v1679_v20 = vrot.slane %v1678_v12, 1  ;;  %v1691_v21 = vrot.slane %v1690_v13, 2  ;;  %v1696_v25 = vrot.slane %v1695_v17, 4  ;;  %v1685_v26 = vmax.f32 %v1683_v6, %v1684_v15 }
 0x11b   : > { %v1736_v11 = vmax.f32 %v1734_v7, %v1735_v19  ;;  %v1742_v27 = vrot.slane %v1741_v1, 4  ;;  %v1748_v30 = vsel %vm1726_vm1, %v3283_v14, -inf  ;;  %v1755_v38 = vsel %vm1726_vm1, %v1643_v43, -inf }
 0x11c   : > { %v1680_v31 = vmax.f32 %v1678_v12, %v1679_v20  ;;  %v1692_v33 = vmax.f32 %v1690_v13, %v1691_v21  ;;  %v1697_v34 = vmax.f32 %v1695_v17, %v1696_v25  ;;  %v1749_v16 = vrot.slane %v1748_v30, 4 }
 0x11d   : > { %v1686_v35 = vrot.slane %v1685_v26, 1  ;;  %v1737_v24 = vrot.slane %v1736_v11, 2  ;;  %v1743_v36 = vmax.f32 %v1741_v1, %v1742_v27  ;;  %v1756_v46 = vrot.slane %v1755_v38, 4 }
 0x11e   : > { %v1693_v39 = vrot.slane %v1692_v33, 1  ;;  %v1698_v29 = vrot.slane %v1697_v34, 2  ;;  %v1704_v41 = vmax.f32 %v1680_v31, 0.0  ;;  %v1750_v48 = vmax.f32 %v1748_v30, %v1749_v16 }
 0x11f   : > { %v1687_v42 = vmax.f32 %v1685_v26, %v1686_v35  ;;  %v1738_v7 = vmax.f32 %v1736_v11, %v1737_v24  ;;  %v1744_v22 = vrot.slane %v1743_v36, 2  ;;  %v1757_v56 = vmax.f32 %v1755_v38, %v1756_v46 }
 0x120   : > { %v1694_v50 = vmax.f32 %v1692_v33, %v1693_v39  ;;  %v1699_v14 = vmax.f32 %v1697_v34, %v1698_v29  ;;  %v1717_v51 = vsel %vm1716_vm3, %v1704_v41, %v1715_v18  ;;  %v1751_v52 = vrot.slane %v1750_v48, 2 }
 0x121   : > { %v1705_v53 = vmax.f32 %v1687_v42, 0.0  ;;  %v1739_v54 = vrot.slane %v1738_v7, 1  ;;  %v1745_v55 = vmax.f32 %v1743_v36, %v1744_v22  ;;  %v1762_v59 = vsel %vm1726_vm1, %v1652_v5, -inf }
 0x122   : > { %v1700_v57 = vrot.slane %v1699_v14, 1  ;;  %v1706_v58 = vmax.f32 %v1694_v50, 0.0  ;;  %v1752_v43 = vmax.f32 %v1750_v48, %v1751_v52  ;;  %v1758_v3 = vrot.slane %v1757_v56, 2 }
 0x123   : > { %v1719_v60 = vsel %vm1718_vm4, %v1705_v53, %v1717_v51  ;;  %v1740_v63 = vmax.f32 %v1738_v7, %v1739_v54  ;;  %v1746_v2 = vrot.slane %v1745_v55, 1  ;;  %v1763_v12 = vrot.slane %v1762_v59, 4 }
 0x124   : > { %v1701_v4 = vmax.f32 %v1699_v14, %v1700_v57  ;;  %v1721_v6 = vsel %vm1720_vm5, %v1706_v58, %v1719_v60  ;;  %v1753_v8 = vrot.slane %v1752_v43, 1  ;;  %v1759_v15 = vmax.f32 %v1757_v56, %v1758_v3 }
 0x125   : > { %v1747_v13 = vmax.f32 %v1745_v55, %v1746_v2  ;;  %v1769_v17 = vmax.f32 %v3300_v9, 0.0  ;;  %v1770_v18 = vmax.f32 %v1740_v63, 0.0  ;;  %v1764_v21 = vmax.f32 %v1762_v59, %v1763_v12 }
 0x126   : > { %v1707_v19 = vmax.f32 %v1701_v4, 0.0  ;;  %v1754_v20 = vmax.f32 %v1752_v43, %v1753_v8  ;;  %v1789_v5 = vrot.slane %v3265_v32, 4  ;;  %v1760_v25 = vrot.slane %v1759_v15, 1 }
 0x127   : > { %v1771_v1 = vmax.f32 %v1747_v13, 0.0  ;;  %v1781_v26 = vsel %vm1714_vm2, %v1770_v18, %v1769_v17  ;;  %v1795_v11 = vsel %vm1659_vm0, %v3269_v40, -inf  ;;  %v1765_v30 = vrot.slane %v1764_v21, 2 }
 0x128   : > { %v1723_v27 = vsel %vm1722_vm6, %v1707_v19, %v1721_v6  ;;  %v1772_v31 = vmax.f32 %v1754_v20, 0.0  ;;  %v1790_v33 = vmax.f32 %v3265_v32, %v1789_v5  ;;  %v1761_v9 = vmax.f32 %v1759_v15, %v1760_v25 }
 0x129   : > { %1725 = vst [vmem:[#allocation3] sm:$0x3f] %v1723_v27  ;;  %v1782_v34 = vsel %vm1716_vm3, %v1771_v1, %v1781_v26  ;;  %v1796_v16 = vrot.slane %v1795_v11, 4  ;;  %v1802_v35 = vsel %vm1659_vm0, %v3275_v49, -inf  ;;  %v1766_v24 = vmax.f32 %v1764_v21, %v1765_v30 }
 0x12a   : > { %v1783_v36 = vsel %vm1718_vm4, %v1772_v31, %v1782_v34  ;;  %v1791_v38 = vrot.slane %v1790_v33, 2  ;;  %v1803_v39 = vrot.slane %v1802_v35, 4  ;;  %v1773_v29 = vmax.f32 %v1761_v9, 0.0 }
 0x12b   : > { %v1797_v41 = vmax.f32 %v1795_v11, %v1796_v16  ;;  %v1809_v48 = vsel %vm1659_vm0, %v3285_v23, -inf  ;;  %v1816_v32 = vsel %vm1659_vm0, %v3293_v44, -inf  ;;  %v1767_v42 = vrot.slane %v1766_v24, 1 }
 0x12c   : > { %v1792_v7 = vmax.f32 %v1790_v33, %v1791_v38  ;;  %v1804_v22 = vmax.f32 %v1802_v35, %v1803_v39  ;;  %v1810_v46 = vrot.slane %v1809_v48, 4  ;;  %v1784_v50 = vsel %vm1720_vm5, %v1773_v29, %v1783_v36 }
 0x12d   : > { %v1798_v14 = vrot.slane %v1797_v41, 2  ;;  %v1817_v51 = vrot.slane %v1816_v32, 4  ;;  %v1823_v52 = vsel %vm1659_vm0, %v3302_v0, -inf  ;;  %v1768_v53 = vmax.f32 %v1766_v24, %v1767_v42 }
 0x12e   : > { %v1793_v54 = vrot.slane %v1792_v7, 1  ;;  %v1805_v55 = vrot.slane %v1804_v22, 2  ;;  %v1811_v56 = vmax.f32 %v1809_v48, %v1810_v46  ;;  %v1824_v43 = vrot.slane %v1823_v52, 4 }
 0x12f   : > { %v1799_v57 = vmax.f32 %v1797_v41, %v1798_v14  ;;  %v1818_v58 = vmax.f32 %v1816_v32, %v1817_v51  ;;  %v1849_v59 = vsel %vm1726_vm1, %v3255_v61, -inf  ;;  %v1774_v60 = vmax.f32 %v1768_v53, 0.0 }
 0x130   : > { %v1794_v63 = vmax.f32 %v1792_v7, %v1793_v54  ;;  %v1806_v2 = vmax.f32 %v1804_v22, %v1805_v55  ;;  %v1812_v3 = vrot.slane %v1811_v56, 2  ;;  %v1825_v8 = vmax.f32 %v1823_v52, %v1824_v43 }
 0x131   : > { %v1800_v4 = vrot.slane %v1799_v57, 1  ;;  %v1819_v6 = vrot.slane %v1818_v58, 2  ;;  %v1850_v12 = vrot.slane %v1849_v59, 4  ;;  %v1785_v13 = vsel %vm1722_vm6, %v1774_v60, %v1784_v50 }
 0x132   : > { %v1807_v15 = vrot.slane %v1806_v2, 1  ;;  %v1813_v17 = vmax.f32 %v1811_v56, %v1812_v3  ;;  %v1830_v18 = vmax.f32 %v1794_v63, 0.0  ;;  %1787 = vst [vmem:[#allocation3 + $0x6] sm:$0x3f] %v1785_v13  ;;  %v1826_v21 = vrot.slane %v1825_v8, 2 }
 0x133   : > { %v1801_v19 = vmax.f32 %v1799_v57, %v1800_v4  ;;  %v1820_v20 = vmax.f32 %v1818_v58, %v1819_v6  ;;  %v1851_v5 = vmax.f32 %v1849_v59, %v1850_v12  ;;  %v1856_v1 = vsel %vm1726_vm1, %v3269_v40, -inf }
 0x134   : > { %v1808_v25 = vmax.f32 %v1806_v2, %v1807_v15  ;;  %v1814_v61 = vrot.slane %v1813_v17, 1  ;;  %v1863_v26 = vsel %vm1726_vm1, %v3275_v49, -inf  ;;  %v1827_v27 = vmax.f32 %v1825_v8, %v1826_v21 }
 0x135   : > { %v1821_v11 = vrot.slane %v1820_v20, 1  ;;  %v1831_v30 = vmax.f32 %v1801_v19, 0.0  ;;  %v1852_v31 = vrot.slane %v1851_v5, 2  ;;  %v1857_v34 = vrot.slane %v1856_v1, 4 }
 0x136   : > { %v1815_v33 = vmax.f32 %v1813_v17, %v1814_v61  ;;  %v1832_v9 = vmax.f32 %v1808_v25, 0.0  ;;  %v1864_v16 = vrot.slane %v1863_v26, 4  ;;  %v1828_v24 = vrot.slane %v1827_v27, 1 }
 0x137   : > { %v1822_v35 = vmax.f32 %v1820_v20, %v1821_v11  ;;  %v1842_v36 = vsel %vm1714_vm2, %v1831_v30, %v1830_v18  ;;  %v1853_v38 = vmax.f32 %v1851_v5, %v1852_v31  ;;  %v1858_v40 = vmax.f32 %v1856_v1, %v1857_v34 }
 0x138   : > { %v1833_v39 = vmax.f32 %v1815_v33, 0.0  ;;  %v1843_v29 = vsel %vm1716_vm3, %v1832_v9, %v1842_v36  ;;  %v1865_v41 = vmax.f32 %v1863_v26, %v1864_v16  ;;  %v1829_v48 = vmax.f32 %v1827_v27, %v1828_v24 }
 0x139   : > { %v1834_v49 = vmax.f32 %v1822_v35, 0.0  ;;  %v1854_v32 = vrot.slane %v1853_v38, 1  ;;  %v1870_v42 = vsel %vm1726_vm1, %v3285_v23, -inf  ;;  %v1859_v22 = vrot.slane %v1858_v40, 2 }
 0x13a   : > { %v1844_v7 = vsel %vm1718_vm4, %v1833_v39, %v1843_v29  ;;  %v1866_v46 = vrot.slane %v1865_v41, 2  ;;  %v1871_v50 = vrot.slane %v1870_v42, 4  ;;  %v1835_v14 = vmax.f32 %v1829_v48, 0.0 }
 0x13b   : > { %v1845_v51 = vsel %vm1720_vm5, %v1834_v49, %v1844_v7  ;;  %v1855_v52 = vmax.f32 %v1853_v38, %v1854_v32  ;;  %v1877_v53 = vsel %vm1726_vm1, %v3293_v44, -inf  ;;  %v1860_v54 = vmax.f32 %v1858_v40, %v1859_v22 }
 0x13c   : > { %v1867_v55 = vmax.f32 %v1865_v41, %v1866_v46  ;;  %v1872_v56 = vmax.f32 %v1870_v42, %v1871_v50  ;;  %v1878_v57 = vrot.slane %v1877_v53, 4  ;;  %v1846_v58 = vsel %vm1722_vm6, %v1835_v14, %v1845_v51 }
 0x13d   : > { %v1884_v23 = vsel %vm1726_vm1, %v3302_v0, -inf  ;;  %v1891_v43 = vmax.f32 %v1855_v52, 0.0  ;;  %v1910_v59 = vsel %vm1659_vm0, %v3261_v28, -inf  ;;  %1848 = vst [vmem:[#allocation3 + $0xc] sm:$0x3f] %v1846_v58  ;;  %v1861_v60 = vrot.slane %v1860_v54, 1 }
 0x13e   : > { %v1868_v63 = vrot.slane %v1867_v55, 1  ;;  %v1873_v2 = vrot.slane %v1872_v56, 2  ;;  %v1879_v3 = vmax.f32 %v1877_v53, %v1878_v57  ;;  %v1885_v4 = vrot.slane %v1884_v23, 4 }
 0x13f   : > { %v1911_v44 = vrot.slane %v1910_v59, 4  ;;  %v1917_v6 = vsel %vm1659_vm0, %v3271_v47, -inf  ;;  %v1924_v8 = vsel %vm1659_vm0, %v3277_v62, -inf  ;;  %v1862_v12 = vmax.f32 %v1860_v54, %v1861_v60 }
 0x140   : > { %v1869_v13 = vmax.f32 %v1867_v55, %v1868_v63  ;;  %v1874_v0 = vmax.f32 %v1872_v56, %v1873_v2  ;;  %v1880_v15 = vrot.slane %v1879_v3, 2  ;;  %v1886_v17 = vmax.f32 %v1884_v23, %v1885_v4 }
 0x141   : > { %v1912_v18 = vmax.f32 %v1910_v59, %v1911_v44  ;;  %v1918_v19 = vrot.slane %v1917_v6, 4  ;;  %v1925_v20 = vrot.slane %v1924_v8, 4  ;;  %v1892_v25 = vmax.f32 %v1862_v12, 0.0 }
 0x142   : > { %v1875_v21 = vrot.slane %v1874_v0, 1  ;;  %v1881_v5 = vmax.f32 %v1879_v3, %v1880_v15  ;;  %v1893_v61 = vmax.f32 %v1869_v13, 0.0  ;;  %v1887_v1 = vrot.slane %v1886_v17, 2 }
 0x143   : > { %v1913_v26 = vrot.slane %v1912_v18, 2  ;;  %v1919_v11 = vmax.f32 %v1917_v6, %v1918_v19  ;;  %v1926_v27 = vmax.f32 %v1924_v8, %v1925_v20  ;;  %v1903_v33 = vsel %vm1714_vm2, %v1892_v25, %v1891_v43 }
 0x144   : > { %v1876_v30 = vmax.f32 %v1874_v0, %v1875_v21  ;;  %v1882_v31 = vrot.slane %v1881_v5, 1  ;;  %v1931_v9 = vsel %vm1659_vm0, %v3289_v37, -inf  ;;  %v1888_v34 = vmax.f32 %v1886_v17, %v1887_v1 }
 0x145   : > { %v1904_v16 = vsel %vm1716_vm3, %v1893_v61, %v1903_v33  ;;  %v1914_v35 = vmax.f32 %v1912_v18, %v1913_v26  ;;  %v1920_v24 = vrot.slane %v1919_v11, 2  ;;  %v1927_v39 = vrot.slane %v1926_v27, 2 }
 0x146   : > { %v1883_v36 = vmax.f32 %v1881_v5, %v1882_v31  ;;  %v1894_v38 = vmax.f32 %v1876_v30, 0.0  ;;  %v1932_v29 = vrot.slane %v1931_v9, 4  ;;  %v1889_v40 = vrot.slane %v1888_v34, 1 }
 0x147   : > { %v1915_v41 = vrot.slane %v1914_v35, 1  ;;  %v1921_v48 = vmax.f32 %v1919_v11, %v1920_v24  ;;  %v1938_v49 = vsel %vm1659_vm0, %v3295_v45, -inf  ;;  %v1928_v7 = vmax.f32 %v1926_v27, %v1927_v39 }
 0x148   : > { %v1895_v32 = vmax.f32 %v1883_v36, 0.0  ;;  %v1905_v42 = vsel %vm1718_vm4, %v1894_v38, %v1904_v16  ;;  %v1933_v22 = vmax.f32 %v1931_v9, %v1932_v29  ;;  %v1890_v46 = vmax.f32 %v1888_v34, %v1889_v40 }
 0x149   : > { %v1916_v50 = vmax.f32 %v1914_v35, %v1915_v41  ;;  %v1922_v14 = vrot.slane %v1921_v48, 1  ;;  %v1939_v51 = vrot.slane %v1938_v49, 4  ;;  %v1929_v53 = vrot.slane %v1928_v7, 1 }
 0x14a   : > { %v1906_v52 = vsel %vm1720_vm5, %v1895_v32, %v1905_v42  ;;  %v1934_v54 = vrot.slane %v1933_v22, 2  ;;  %v1945_v55 = vsel %vm1659_vm0, %v3304_v10, -inf  ;;  %v1896_v56 = vmax.f32 %v1890_v46, 0.0 }
 0x14b   : > { %v1923_v57 = vmax.f32 %v1921_v48, %v1922_v14  ;;  %v1940_v58 = vmax.f32 %v1938_v49, %v1939_v51  ;;  %v1946_v23 = vrot.slane %v1945_v55, 4  ;;  %v1930_v43 = vmax.f32 %v1928_v7, %v1929_v53 }
 0x14c   : > { %v1935_v59 = vmax.f32 %v1933_v22, %v1934_v54  ;;  %v1952_v60 = vmax.f32 %v1916_v50, 0.0  ;;  %v1971_v63 = vsel %vm1726_vm1, %v3261_v28, -inf  ;;  %v1907_v2 = vsel %vm1722_vm6, %v1896_v56, %v1906_v52 }
 0x14d   : > { %v1941_v3 = vrot.slane %v1940_v58, 2  ;;  %v1947_v4 = vmax.f32 %v1945_v55, %v1946_v23  ;;  %v1953_v44 = vmax.f32 %v1923_v57, 0.0  ;;  %1909 = vst [vmem:[#allocation3 + $0x12] sm:$0x3f] %v1907_v2  ;;  %v1954_v8 = vmax.f32 %v1930_v43, 0.0 }
 0x14e   : > { %v1936_v6 = vrot.slane %v1935_v59, 1  ;;  %v1972_v12 = vrot.slane %v1971_v63, 4  ;;  %v1978_v13 = vsel %vm1726_vm1, %v3271_v47, -inf  ;;  %v1985_v21 = vsel %vm1726_vm1, %v3277_v62, -inf }
 0x14f   : > { %v1942_v0 = vmax.f32 %v1940_v58, %v1941_v3  ;;  %v1948_v15 = vrot.slane %v1947_v4, 2  ;;  %v1964_v17 = vsel %vm1714_vm2, %v1953_v44, %v1952_v60  ;;  %v1979_v18 = vrot.slane %v1978_v13, 4 }
 0x150   : > { %v1937_v19 = vmax.f32 %v1935_v59, %v1936_v6  ;;  %v1965_v28 = vsel %vm1716_vm3, %v1954_v8, %v1964_v17  ;;  %v1973_v20 = vmax.f32 %v1971_v63, %v1972_v12  ;;  %v1986_v1 = vrot.slane %v1985_v21, 4 }
 0x151   : > { %v1943_v5 = vrot.slane %v1942_v0, 1  ;;  %v1949_v25 = vmax.f32 %v1947_v4, %v1948_v15  ;;  %v1980_v61 = vmax.f32 %v1978_v13, %v1979_v18  ;;  %v1992_v47 = vsel %vm1726_vm1, %v3289_v37, -inf }
 0x152   : > { %v1955_v26 = vmax.f32 %v1937_v19, 0.0  ;;  %v1974_v11 = vrot.slane %v1973_v20, 2  ;;  %v1999_v27 = vsel %vm1726_vm1, %v3295_v45, -inf  ;;  %v1987_v9 = vmax.f32 %v1985_v21, %v1986_v1 }
 0x153   : > { %v1944_v30 = vmax.f32 %v1942_v0, %v1943_v5  ;;  %v1950_v31 = vrot.slane %v1949_v25, 1  ;;  %v1981_v33 = vrot.slane %v1980_v61, 2  ;;  %v1993_v62 = vrot.slane %v1992_v47, 4 }
 0x154   : > { %v1966_v34 = vsel %vm1718_vm4, %v1955_v26, %v1965_v28  ;;  %v1975_v16 = vmax.f32 %v1973_v20, %v1974_v11  ;;  %v2000_v35 = vrot.slane %v1999_v27, 4  ;;  %v1988_v39 = vrot.slane %v1987_v9, 2 }
 0x155   : > { %v1951_v24 = vmax.f32 %v1949_v25, %v1950_v31  ;;  %v1956_v36 = vmax.f32 %v1944_v30, 0.0  ;;  %v1982_v38 = vmax.f32 %v1980_v61, %v1981_v33  ;;  %v1994_v40 = vmax.f32 %v1992_v47, %v1993_v62 }
 0x156   : > { %v1976_v29 = vrot.slane %v1975_v16, 1  ;;  %v2001_v41 = vmax.f32 %v1999_v27, %v2000_v35  ;;  %v2006_v37 = vsel %vm1726_vm1, %v3304_v10, -inf  ;;  %v1989_v32 = vmax.f32 %v1987_v9, %v1988_v39 }
 0x157   : > { %v1957_v45 = vmax.f32 %v1951_v24, 0.0  ;;  %v1967_v48 = vsel %vm1720_vm5, %v1956_v36, %v1966_v34  ;;  %v1983_v49 = vrot.slane %v1982_v38, 1  ;;  %v1995_v7 = vrot.slane %v1994_v40, 2 }
 0x158   : > { %v1977_v42 = vmax.f32 %v1975_v16, %v1976_v29  ;;  %v2002_v22 = vrot.slane %v2001_v41, 2  ;;  %v2007_v46 = vrot.slane %v2006_v37, 4  ;;  %v1990_v51 = vrot.slane %v1989_v32, 1 }
 0x159   : > { %v1968_v50 = vsel %vm1722_vm6, %v1957_v45, %v1967_v48  ;;  %v1984_v14 = vmax.f32 %v1982_v38, %v1983_v49  ;;  %v1996_v52 = vmax.f32 %v1994_v40, %v1995_v7 }
 0x15a   : > { %1970 = vst [vmem:[#allocation3 + $0x18] sm:$0x3f] %v1968_v50  ;;  %v2003_v53 = vmax.f32 %v2001_v41, %v2002_v22  ;;  %v2008_v54 = vmax.f32 %v2006_v37, %v2007_v46  ;;  %v2013_v55 = vmax.f32 %v1977_v42, 0.0  ;;  %v1991_v56 = vmax.f32 %v1989_v32, %v1990_v51 }
 0x15b   : > { %v2014_v10 = vmax.f32 %v1984_v14, 0.0  ;;  %v1997_v57 = vrot.slane %v1996_v52, 1 }
 0x15c   : > { %v2004_v58 = vrot.slane %v2003_v53, 1  ;;  %v2009_v23 = vrot.slane %v2008_v54, 2  ;;  %v2015_v43 = vmax.f32 %v1991_v56, 0.0 }
 0x15d   : > { %v2025_v59 = vsel %vm1714_vm2, %v2014_v10, %v2013_v55  ;;  %v1998_v60 = vmax.f32 %v1996_v52, %v1997_v57 }
 0x15e   : > { %v2005_v63 = vmax.f32 %v2003_v53, %v2004_v58  ;;  %v2010_v2 = vmax.f32 %v2008_v54, %v2009_v23  ;;  %v2026_v3 = vsel %vm1716_vm3, %v2015_v43, %v2025_v59 }
 0x15f   : > { %v2016_v44 = vmax.f32 %v1998_v60, 0.0 }
 0x160   : > { %v2011_v4 = vrot.slane %v2010_v2, 1  ;;  %v2017_v6 = vmax.f32 %v2005_v63, 0.0 }
 0x161   : > { %v2027_v12 = vsel %vm1718_vm4, %v2016_v44, %v2026_v3 }
 0x162   : > { %v2012_v8 = vmax.f32 %v2010_v2, %v2011_v4  ;;  %v2028_v13 = vsel %vm1720_vm5, %v2017_v6, %v2027_v12 }
 0x163   : > { %2035 = sbr.rel (%p2239_p3) target bundleno = 362 (0x16a), region = 47 }
 0x164   : > { %v2018_v0 = vmax.f32 %v2012_v8, 0.0 }
 0x166   : > { %v2029_v15 = vsel %vm1722_vm6, %v2018_v0, %v2028_v13 }
 0x167   : > { %2031 = vst [vmem:[#allocation3 + $0x1e] sm:$0x3f] %v2029_v15 }
 0x168   : > { %v2365_v17 = vmov 0.0  }
 0x169   : > { %2036 = vst [vmem:[%s3429_s3] sm:$0xff] %v2365_v17  ;;  %2037 = vst [vmem:[%s3429_s3 + $0x8] sm:$0x3] %v2365_v17 }
 0x16a PF: > { %vm2047_vm7 = vcmask 293888   ;;  %v2040_v28 = vld [vmem:[%s2507_s28] sm:$0xff]  ;;  %v2044_v20 = vld [vmem:[#allocation3 + $0x10] sm:$0xff]  ;;  %v2043_v21 = vld [vmem:[#allocation3 + $0x8] sm:$0xff] }
 0x16b   : > { %2264 = vmatprep.mubr.msk.f32.mxu0 %vm2047_vm7, %v2040_v28  ;;  %v2042_v5 = vld [vmem:[#allocation3] sm:$0xff]  ;;  %v2041_v25 = vld [vmem:[%s2507_s28 + $0x8] sm:$0x3] }
 0x170   : > { %v2046_v18 = vld [vmem:[#allocation3 + $0x20] sm:$0xf]  ;;  %v2045_v19 = vld [vmem:[#allocation3 + $0x18] sm:$0xff]  ;;  %v2039_v61 = vld [vmem:[%s3429_s3 + $0x8] sm:$0x3] }
 0x171   : > { %2254 = vmatprep.subr.msk.mxu0 %vm1659_vm0, %v2046_v18  ;;  %v2038_v26 = vld [vmem:[%s3429_s3] sm:$0xff] }
 0x172   : > { %2255 = vmatpush3.msk.msra.mxu0 %vm1659_vm0, %v2046_v18 }
 0x173   : > { %2256 = vmatprep.subr.mxu0 %v2045_v19 }
 0x174   : > { %2257 = vmatpush3.msra.mxu0 %v2045_v19 }
 0x175   : > { %2258 = vmatprep.subr.mxu0 %v2044_v20 }
 0x176   : > { %2259 = vmatpush3.msra.mxu0 %v2044_v20 }
 0x177   : > { %2260 = vmatprep.subr.mxu0 %v2043_v21 }
 0x178   : > { %2261 = vmatpush3.msra.mxu0 %v2043_v21 }
 0x179   : > { %2262 = vmatprep.subr.mxu0 %v2042_v5 }
 0x17a   : > { %2263 = vmatpush3.msra.mxu0 %v2042_v5 }
 0x17b   : > { %2265 = vmatmul.mubr.msk.f32.vlgmr.msra.gmra.mxu0 %vm2047_vm7, %v2041_v25 }
 0x23b   : > { %v2266_v1 = vpop.f32.mrf.mxu0 }
 0x23c   : > { %v2133_v11 = vadd.f32 %v2266_v1, %v2039_v61 }
 0x23d   : > { %v2123_v47 = vpop.f32.mrf.mxu0 }
 0x23e   : > { %2135 = vst [vmem:[%s3429_s3 + $0x8] sm:$0x3] %v2133_v11  ;;  %v2132_v27 = vadd.f32 %v2123_v47, %v2038_v26 }
 0x240   : > { %2134 = vst [vmem:[%s3429_s3] sm:$0xff] %v2132_v27 }
 0x241 PF: > { %s14_s14 = sadd.s32 1, %s2357_s14   ;;  %s3432_s12 = smov %s2353_s13 }
 0x242   : > { %p11_p4 = scmp.ge.s32.totalorder %s14_s14, 12   ;;  %s3433_s13 = smov %s3435_s16 }
 0x244   :  { %13 = sbr.rel (!%p11_p4) target bundleno = 2 (0x2), region = 93 }
 0x249   :  { %2155 = vsyncpa [#allocation5], 1 }
 0x24a   :  { %2157 = vsyncpa [#allocation5 + $0x1], 1 }

</bundles_post_ra>
